<compile_context>
chip_gen: v7x
topology: tpu7x:2x2x1
jax: 0.10.0
libtpu: 0.0.40
codegen_flags: <defaults>
</compile_context>

<pallas_src>
import functools

import jax
import jax.numpy as jnp
from jax import lax
from jax.experimental import pallas as pl
from jax.experimental.pallas import tpu as pltpu


def bayesian_linear_kernel(x_ref, qmw_ref, qsw_ref, ew_ref, pmw_ref, psw_ref,
                           qmb_ref, qsb_ref, eb_ref, pmb_ref, psb_ref,
                           out_ref, kl_ref, *, matmul_dtype=jnp.float32):
    """Grid = (batch tiles i, out tiles j, K tiles k); K is the reduction axis (last)."""
    k = pl.program_id(2)
    nk = pl.num_programs(2)

    @pl.when(k == 0)
    def _init():
        out_ref[...] = jnp.zeros_like(out_ref)
        kl_ref[...] = jnp.zeros_like(kl_ref)

    q_mu = qmw_ref[...]          # (tn, tk)
    q_sigma = qsw_ref[...]
    p_mu = pmw_ref[...]
    p_sigma = psw_ref[...]

    # Reparameterized weight sample for this tile (f32, VPU).
    w = q_mu + q_sigma * ew_ref[...]

    # MXU: contract the last dim of x (tm, tk) with the last dim of w (tn, tk)
    # -> (tm, tn). Equivalent to x @ w.T but without materializing a transpose.
    out_ref[...] += lax.dot_general(
        x_ref[...].astype(matmul_dtype), w.astype(matmul_dtype),
        dimension_numbers=(((1,), (1,)), ((), ())),
        preferred_element_type=jnp.float32)

    # Diagonal-Gaussian KL contribution of this weight tile (f32 VPU/EUP work that
    # hides under the matmul). Scalar is broadcast over the lane-dense (8,128) block.
    dmu = p_mu - q_mu
    kl_tile = jnp.sum(jnp.log(p_sigma / q_sigma)
                      + (q_sigma * q_sigma + dmu * dmu) / (2.0 * p_sigma * p_sigma)
                      - 0.5)
    kl_ref[...] += kl_tile

    @pl.when(k == nk - 1)
    def _finalize():
        # Bias column (the "+1" of the original (out, in+1) layout): sampled bias row
        # added to the outputs, plus its KL contribution.
        b_mu = qmb_ref[...]      # (1, tn)
        b_sigma = qsb_ref[...]
        pb_mu = pmb_ref[...]
        pb_sigma = psb_ref[...]
        b = b_mu + b_sigma * eb_ref[...]
        out_ref[...] += b        # broadcast over the tm batch rows
        dbb = pb_mu - b_mu
        kl_b = jnp.sum(jnp.log(pb_sigma / b_sigma)
                       + (b_sigma * b_sigma + dbb * dbb) / (2.0 * pb_sigma * pb_sigma)
                       - 0.5)
        kl_ref[...] += kl_b


def bayesian_linear_forward(x, q_mu, q_sigma, p_mu, p_sigma, eps, p_log_sigma=None,
                            *, tm=128, tn=256, tk=512, matmul_dtype=jnp.float32):
    """x: (B, in_features). Parameters / eps: (out_features, in_features + 1).

    Returns (outputs (B, out_features) f32, kl scalar f32).
    """
    del p_log_sigma  # ivon branch: KL uses the stored p_sigma parameter (see module).
    B, in_features = x.shape
    out_features = q_mu.shape[0]
    assert q_mu.shape == (out_features, in_features + 1)

    # Clamp tile sizes to the problem and check TPU-friendly alignment.
    tm = min(tm, B)
    tn = min(tn, out_features)
    tk = min(tk, in_features)
    assert B % tm == 0 and (tm % 8 == 0 or tm == B), "tm must be 8-aligned (or == B)"
    assert out_features % tn == 0 and tn % 128 == 0, "tn must be a multiple of 128"
    assert in_features % tk == 0 and tk % 128 == 0, "tk must be a multiple of 128"
    nbi, nbj, nbk = B // tm, out_features // tn, in_features // tk

    # Split every (out, in+1) parameter into its (out, in) matmul part and its
    # bias column, presented as a (1, out) row so the in-kernel add is a plain
    # sublane broadcast (no transpose).
    def split(a):
        return a[:, :in_features], a[:, in_features].reshape(1, out_features)

    qmw, qmb = split(q_mu)
    qsw, qsb = split(q_sigma)
    pmw, pmb = split(p_mu)
    psw, psb = split(p_sigma)
    ew, eb = split(eps)

    kernel = functools.partial(bayesian_linear_kernel, matmul_dtype=matmul_dtype)

    w_spec = pl.BlockSpec((tn, tk), lambda i, j, k: (j, k))
    b_spec = pl.BlockSpec((1, tn), lambda i, j, k: (0, j))

    outputs, kl_part = pl.pallas_call(
        kernel,
        out_shape=(
            jax.ShapeDtypeStruct((B, out_features), jnp.float32),
            # Lane-dense per-(i,j)-tile KL partial blocks; reduced in the wrapper.
            jax.ShapeDtypeStruct((nbi * 8, nbj * 128), jnp.float32),
        ),
        grid_spec=pltpu.PrefetchScalarGridSpec(
            num_scalar_prefetch=0,
            grid=(nbi, nbj, nbk),
            in_specs=[
                pl.BlockSpec((tm, tk), lambda i, j, k: (i, k)),   # x
                w_spec, w_spec, w_spec, w_spec, w_spec,           # q_mu_w, q_sigma_w, eps_w, p_mu_w, p_sigma_w
                b_spec, b_spec, b_spec, b_spec, b_spec,           # q_mu_b, q_sigma_b, eps_b, p_mu_b, p_sigma_b
            ],
            out_specs=(
                pl.BlockSpec((tm, tn), lambda i, j, k: (i, j)),   # outputs (resident over k)
                pl.BlockSpec((8, 128), lambda i, j, k: (i, j)),   # KL partials (resident over k)
            ),
        ),
        compiler_params=pltpu.CompilerParams(
            dimension_semantics=("parallel", "parallel", "arbitrary"),
            vmem_limit_bytes=48 * 1024 * 1024,   # headroom under v7x's 64 MiB VMEM
        ),
    )(x, qmw, qsw, ew, pmw, psw, qmb, qsb, eb, pmb, psb)

    # Each (8,128) block of row-block i=0 holds its (j-tile) KL total replicated;
    # take one lane per out-tile and sum (exact, no over-count).
    kl = jnp.sum(kl_part[0, ::128])
    return outputs, kl


if __name__ == "__main__":
    # Small shapes consistent with the module: a single Bayesian linear layer.
    B, in_features, out_features = 16, 256, 256
    dtype = jnp.float32

    key = jax.random.PRNGKey(0)
    k_x, k_pw, k_pb, k_qw, k_qb, k_eps = jax.random.split(key, 6)

    x = jax.random.normal(k_x, (B, in_features), dtype=dtype)

    # Deterministic parameter init (mirrors __init__ shapes for 'diagonal'/'ivon').
    init_p_w = 0.1 * jax.random.normal(k_pw, (out_features, in_features), dtype=dtype)
    init_p_b = 0.1 * jax.random.normal(k_pb, (out_features,), dtype=dtype)
    init_q_w = 0.1 * jax.random.normal(k_qw, (out_features, in_features), dtype=dtype)
    init_q_b = 0.1 * jax.random.normal(k_qb, (out_features,), dtype=dtype)

    p_mu = jnp.concatenate([init_p_w, init_p_b[:, None]], axis=1)       # (out, in+1)
    q_mu = jnp.concatenate([init_q_w, init_q_b[:, None]], axis=1)       # (out, in+1)
    q_sigma = 0.05 * jnp.ones((out_features, in_features + 1), dtype=dtype)
    p_sigma = 0.05 * jnp.ones((out_features, in_features + 1), dtype=dtype)

    # randn_like(q_sigma) — sampled deterministically here, consumed in-kernel.
    eps = jax.random.normal(k_eps, (out_features, in_features + 1), dtype=dtype)

    p_log_sigma = jnp.asarray(-3.0, dtype=dtype)  # unused on the ivon branch (see note)

    # Small tiles so the demo exercises a full (2, 2, 2) grid with K accumulation.
    outputs, kl = bayesian_linear_forward(
        x, q_mu, q_sigma, p_mu, p_sigma, eps, p_log_sigma,
        tm=8, tn=128, tk=128, matmul_dtype=jnp.float32)
    jax.block_until_ready((outputs, kl))

    # Pure-JAX reference (exactly the torch module's ivon/diagonal math).
    x_aug = jnp.concatenate([x, jnp.ones((B, 1), dtype=dtype)], axis=1)
    w_full = q_mu + q_sigma * eps
    out_ref = x_aug @ w_full.T
    kl_ref = jnp.sum(jnp.log(p_sigma) - jnp.log(q_sigma)
                     + (q_sigma ** 2 + (p_mu - q_mu) ** 2) / (2 * p_sigma ** 2) - 0.5)

    assert jnp.allclose(outputs, out_ref, atol=1e-4, rtol=1e-4), "outputs mismatch"
    assert jnp.allclose(kl, kl_ref, atol=1e-2, rtol=1e-4), "kl mismatch"

    print("KERNEL_OK")
</pallas_src>

<mosaic_0001>
module attributes {stable_mosaic.version = 11 : i64} {
  func.func @bayesian_linear_kernel(%arg0: i32, %arg1: i32, %arg2: i32, %arg3: memref<8x128xf32, #tpu.memory_space<vmem>>, %arg4: memref<128x128xf32, #tpu.memory_space<vmem>>, %arg5: memref<128x128xf32, #tpu.memory_space<vmem>>, %arg6: memref<128x128xf32, #tpu.memory_space<vmem>>, %arg7: memref<128x128xf32, #tpu.memory_space<vmem>>, %arg8: memref<128x128xf32, #tpu.memory_space<vmem>>, %arg9: memref<1x128xf32, #tpu.memory_space<vmem>>, %arg10: memref<1x128xf32, #tpu.memory_space<vmem>>, %arg11: memref<1x128xf32, #tpu.memory_space<vmem>>, %arg12: memref<1x128xf32, #tpu.memory_space<vmem>>, %arg13: memref<1x128xf32, #tpu.memory_space<vmem>>, %arg14: memref<8x128xf32, #tpu.memory_space<vmem>>, %arg15: memref<8x128xf32, #tpu.memory_space<vmem>>) attributes {dimension_semantics = [#tpu.dimension_semantics<parallel>, #tpu.dimension_semantics<parallel>, #tpu.dimension_semantics<arbitrary>], iteration_bounds = array<i64: 2, 2, 2>, scalar_prefetch = 0 : i64, scratch_operands = 0 : i64, tpu.core_type = #tpu.core_type<tc>, window_params = [{transform_indices = @transform_0, window_bounds = array<i64: 8, 128>}, {transform_indices = @transform_1, window_bounds = array<i64: 128, 128>}, {transform_indices = @transform_2, window_bounds = array<i64: 128, 128>}, {transform_indices = @transform_3, window_bounds = array<i64: 128, 128>}, {transform_indices = @transform_4, window_bounds = array<i64: 128, 128>}, {transform_indices = @transform_5, window_bounds = array<i64: 128, 128>}, {transform_indices = @transform_6, window_bounds = array<i64: 1, 128>}, {transform_indices = @transform_7, window_bounds = array<i64: 1, 128>}, {transform_indices = @transform_8, window_bounds = array<i64: 1, 128>}, {transform_indices = @transform_9, window_bounds = array<i64: 1, 128>}, {transform_indices = @transform_10, window_bounds = array<i64: 1, 128>}, {transform_indices = @transform_11, window_bounds = array<i64: 8, 128>}, {transform_indices = @transform_12, window_bounds = array<i64: 8, 128>}]} {
    %c0_i32 = arith.constant 0 : i32
    %0 = arith.cmpi eq, %arg2, %c0_i32 : i32
    %1 = arith.extui %0 : i1 to i32
    %c0_i32_0 = arith.constant 0 : i32
    %2 = arith.cmpi ne, %1, %c0_i32_0 : i32
    scf.if %2 {
      %cst_24 = arith.constant 0.000000e+00 : f32
      %39 = vector.broadcast %cst_24 : f32 to vector<8x128xf32>
      %c0_25 = arith.constant 0 : index
      %c0_26 = arith.constant 0 : index
      %40 = vector.load %arg14[%c0_25, %c0_26] : memref<8x128xf32, #tpu.memory_space<vmem>>, vector<8x128xf32>
      tpu.vector_store %arg14[%c0_25, %c0_26], %39 {strides = array<i32>} : memref<8x128xf32, #tpu.memory_space<vmem>>, vector<8x128xf32>,
      %cst_27 = arith.constant 0.000000e+00 : f32
      %41 = vector.broadcast %cst_27 : f32 to vector<8x128xf32>
      %c0_28 = arith.constant 0 : index
      %c0_29 = arith.constant 0 : index
      %42 = vector.load %arg15[%c0_28, %c0_29] : memref<8x128xf32, #tpu.memory_space<vmem>>, vector<8x128xf32>
      tpu.vector_store %arg15[%c0_28, %c0_29], %41 {strides = array<i32>} : memref<8x128xf32, #tpu.memory_space<vmem>>, vector<8x128xf32>,
    } else {
    }
    %c0 = arith.constant 0 : index
    %c0_1 = arith.constant 0 : index
    %3 = vector.load %arg4[%c0, %c0_1] : memref<128x128xf32, #tpu.memory_space<vmem>>, vector<128x128xf32>
    %c0_2 = arith.constant 0 : index
    %c0_3 = arith.constant 0 : index
    %4 = vector.load %arg5[%c0_2, %c0_3] : memref<128x128xf32, #tpu.memory_space<vmem>>, vector<128x128xf32>
    %c0_4 = arith.constant 0 : index
    %c0_5 = arith.constant 0 : index
    %5 = vector.load %arg7[%c0_4, %c0_5] : memref<128x128xf32, #tpu.memory_space<vmem>>, vector<128x128xf32>
    %c0_6 = arith.constant 0 : index
    %c0_7 = arith.constant 0 : index
    %6 = vector.load %arg8[%c0_6, %c0_7] : memref<128x128xf32, #tpu.memory_space<vmem>>, vector<128x128xf32>
    %c0_8 = arith.constant 0 : index
    %c0_9 = arith.constant 0 : index
    %7 = vector.load %arg6[%c0_8, %c0_9] : memref<128x128xf32, #tpu.memory_space<vmem>>, vector<128x128xf32>
    %8 = arith.mulf %4, %7 : vector<128x128xf32>
    %9 = arith.addf %3, %8 : vector<128x128xf32>
    %c0_10 = arith.constant 0 : index
    %c0_11 = arith.constant 0 : index
    %10 = vector.load %arg14[%c0_10, %c0_11] : memref<8x128xf32, #tpu.memory_space<vmem>>, vector<8x128xf32>
    %c0_12 = arith.constant 0 : index
    %c0_13 = arith.constant 0 : index
    %11 = vector.load %arg3[%c0_12, %c0_13] : memref<8x128xf32, #tpu.memory_space<vmem>>, vector<8x128xf32>
    %cst = arith.constant dense<0.000000e+00> : vector<8x128xf32>
    %12 = tpu.matmul %11, %9, %cst {dimension_numbers = #tpu.dot_dimension_numbers<[1], [1], [0], [0], [0, 0, 1, 0], [], []>} : vector<8x128xf32>, vector<128x128xf32>, vector<8x128xf32> -> vector<8x128xf32>
    %13 = arith.addf %10, %12 : vector<8x128xf32>
    %c0_14 = arith.constant 0 : index
    %c0_15 = arith.constant 0 : index
    %14 = vector.load %arg14[%c0_14, %c0_15] : memref<8x128xf32, #tpu.memory_space<vmem>>, vector<8x128xf32>
    tpu.vector_store %arg14[%c0_14, %c0_15], %13 {strides = array<i32>} : memref<8x128xf32, #tpu.memory_space<vmem>>, vector<8x128xf32>,
    %15 = arith.subf %5, %3 : vector<128x128xf32>
    %16 = arith.divf %6, %4 : vector<128x128xf32>
    %17 = math.log %16 : vector<128x128xf32>
    %18 = arith.mulf %4, %4 : vector<128x128xf32>
    %19 = arith.mulf %15, %15 : vector<128x128xf32>
    %20 = arith.addf %18, %19 : vector<128x128xf32>
    %cst_16 = arith.constant 2.000000e+00 : f32
    %21 = vector.broadcast %cst_16 : f32 to vector<128x128xf32>
    %22 = arith.mulf %21, %6 : vector<128x128xf32>
    %23 = arith.mulf %22, %6 : vector<128x128xf32>
    %24 = arith.divf %20, %23 : vector<128x128xf32>
    %25 = arith.addf %17, %24 : vector<128x128xf32>
    %cst_17 = arith.constant 5.000000e-01 : f32
    %26 = vector.broadcast %cst_17 : f32 to vector<128x128xf32>
    %27 = arith.subf %25, %26 : vector<128x128xf32>
    %28 = vector.shape_cast %27 : vector<128x128xf32> to vector<1x128x128xf32>
    %cst_18 = arith.constant dense<0.000000e+00> : vector<1xf32>
    %29 = vector.multi_reduction <add>, %28, %cst_18 [1, 2] : vector<1x128x128xf32> to vector<1xf32>
    %30 = vector.shape_cast %29 : vector<1xf32> to vector<1x1x1xf32>
    %31 = vector.extract %30[0, 0, 0] : f32 from vector<1x1x1xf32>
    %c0_19 = arith.constant 0 : index
    %c0_20 = arith.constant 0 : index
    %32 = vector.load %arg15[%c0_19, %c0_20] : memref<8x128xf32, #tpu.memory_space<vmem>>, vector<8x128xf32>
    %33 = vector.broadcast %31 : f32 to vector<8x128xf32>
    %34 = arith.addf %32, %33 : vector<8x128xf32>
    %c0_21 = arith.constant 0 : index
    %c0_22 = arith.constant 0 : index
    %35 = vector.load %arg15[%c0_21, %c0_22] : memref<8x128xf32, #tpu.memory_space<vmem>>, vector<8x128xf32>
    tpu.vector_store %arg15[%c0_21, %c0_22], %34 {strides = array<i32>} : memref<8x128xf32, #tpu.memory_space<vmem>>, vector<8x128xf32>,
    %c1_i32 = arith.constant 1 : i32
    %36 = arith.cmpi eq, %arg2, %c1_i32 : i32
    %37 = arith.extui %36 : i1 to i32
    %c0_i32_23 = arith.constant 0 : i32
    %38 = arith.cmpi ne, %37, %c0_i32_23 : i32
    scf.if %38 {
      %c0_24 = arith.constant 0 : index
      %c0_25 = arith.constant 0 : index
      %39 = vector.load %arg9[%c0_24, %c0_25] : memref<1x128xf32, #tpu.memory_space<vmem>>, vector<1x128xf32>
      %c0_26 = arith.constant 0 : index
      %c0_27 = arith.constant 0 : index
      %40 = vector.load %arg10[%c0_26, %c0_27] : memref<1x128xf32, #tpu.memory_space<vmem>>, vector<1x128xf32>
      %c0_28 = arith.constant 0 : index
      %c0_29 = arith.constant 0 : index
      %41 = vector.load %arg12[%c0_28, %c0_29] : memref<1x128xf32, #tpu.memory_space<vmem>>, vector<1x128xf32>
      %c0_30 = arith.constant 0 : index
      %c0_31 = arith.constant 0 : index
      %42 = vector.load %arg13[%c0_30, %c0_31] : memref<1x128xf32, #tpu.memory_space<vmem>>, vector<1x128xf32>
      %c0_32 = arith.constant 0 : index
      %c0_33 = arith.constant 0 : index
      %43 = vector.load %arg11[%c0_32, %c0_33] : memref<1x128xf32, #tpu.memory_space<vmem>>, vector<1x128xf32>
      %44 = arith.mulf %40, %43 : vector<1x128xf32>
      %45 = arith.addf %39, %44 : vector<1x128xf32>
      %c0_34 = arith.constant 0 : index
      %c0_35 = arith.constant 0 : index
      %46 = vector.load %arg14[%c0_34, %c0_35] : memref<8x128xf32, #tpu.memory_space<vmem>>, vector<8x128xf32>
      %47 = vector.broadcast %45 : vector<1x128xf32> to vector<8x128xf32>
      %48 = arith.addf %46, %47 : vector<8x128xf32>
      %c0_36 = arith.constant 0 : index
      %c0_37 = arith.constant 0 : index
      %49 = vector.load %arg14[%c0_36, %c0_37] : memref<8x128xf32, #tpu.memory_space<vmem>>, vector<8x128xf32>
      tpu.vector_store %arg14[%c0_36, %c0_37], %48 {strides = array<i32>} : memref<8x128xf32, #tpu.memory_space<vmem>>, vector<8x128xf32>,
      %50 = arith.subf %41, %39 : vector<1x128xf32>
      %51 = arith.divf %42, %40 : vector<1x128xf32>
      %52 = math.log %51 : vector<1x128xf32>
      %53 = arith.mulf %40, %40 : vector<1x128xf32>
      %54 = arith.mulf %50, %50 : vector<1x128xf32>
      %55 = arith.addf %53, %54 : vector<1x128xf32>
      %cst_38 = arith.constant 2.000000e+00 : f32
      %56 = vector.broadcast %cst_38 : f32 to vector<1x128xf32>
      %57 = arith.mulf %56, %42 : vector<1x128xf32>
      %58 = arith.mulf %57, %42 : vector<1x128xf32>
      %59 = arith.divf %55, %58 : vector<1x128xf32>
      %60 = arith.addf %52, %59 : vector<1x128xf32>
      %cst_39 = arith.constant 5.000000e-01 : f32
      %61 = vector.broadcast %cst_39 : f32 to vector<1x128xf32>
      %62 = arith.subf %60, %61 : vector<1x128xf32>
      %63 = vector.shape_cast %62 : vector<1x128xf32> to vector<1x1x128xf32>
      %cst_40 = arith.constant dense<0.000000e+00> : vector<1xf32>
      %64 = vector.multi_reduction <add>, %63, %cst_40 [1, 2] : vector<1x1x128xf32> to vector<1xf32>
      %65 = vector.shape_cast %64 : vector<1xf32> to vector<1x1x1xf32>
      %66 = vector.extract %65[0, 0, 0] : f32 from vector<1x1x1xf32>
      %c0_41 = arith.constant 0 : index
      %c0_42 = arith.constant 0 : index
      %67 = vector.load %arg15[%c0_41, %c0_42] : memref<8x128xf32, #tpu.memory_space<vmem>>, vector<8x128xf32>
      %68 = vector.broadcast %66 : f32 to vector<8x128xf32>
      %69 = arith.addf %67, %68 : vector<8x128xf32>
      %c0_43 = arith.constant 0 : index
      %c0_44 = arith.constant 0 : index
      %70 = vector.load %arg15[%c0_43, %c0_44] : memref<8x128xf32, #tpu.memory_space<vmem>>, vector<8x128xf32>
      tpu.vector_store %arg15[%c0_43, %c0_44], %69 {strides = array<i32>} : memref<8x128xf32, #tpu.memory_space<vmem>>, vector<8x128xf32>,
    } else {
    }
    return
  }
  func.func @transform_0(%arg0: i32, %arg1: i32, %arg2: i32) -> (i32, i32) {
    %c0_i32 = arith.constant 0 : i32
    return %arg0, %arg2 : i32, i32
  }
  func.func @transform_1(%arg0: i32, %arg1: i32, %arg2: i32) -> (i32, i32) {
    %c0_i32 = arith.constant 0 : i32
    return %arg1, %arg2 : i32, i32
  }
  func.func @transform_2(%arg0: i32, %arg1: i32, %arg2: i32) -> (i32, i32) {
    %c0_i32 = arith.constant 0 : i32
    return %arg1, %arg2 : i32, i32
  }
  func.func @transform_3(%arg0: i32, %arg1: i32, %arg2: i32) -> (i32, i32) {
    %c0_i32 = arith.constant 0 : i32
    return %arg1, %arg2 : i32, i32
  }
  func.func @transform_4(%arg0: i32, %arg1: i32, %arg2: i32) -> (i32, i32) {
    %c0_i32 = arith.constant 0 : i32
    return %arg1, %arg2 : i32, i32
  }
  func.func @transform_5(%arg0: i32, %arg1: i32, %arg2: i32) -> (i32, i32) {
    %c0_i32 = arith.constant 0 : i32
    return %arg1, %arg2 : i32, i32
  }
  func.func @transform_6(%arg0: i32, %arg1: i32, %arg2: i32) -> (i32, i32) {
    %c0_i32 = arith.constant 0 : i32
    %c0_i32_0 = arith.constant 0 : i32
    return %c0_i32, %arg1 : i32, i32
  }
  func.func @transform_7(%arg0: i32, %arg1: i32, %arg2: i32) -> (i32, i32) {
    %c0_i32 = arith.constant 0 : i32
    %c0_i32_0 = arith.constant 0 : i32
    return %c0_i32, %arg1 : i32, i32
  }
  func.func @transform_8(%arg0: i32, %arg1: i32, %arg2: i32) -> (i32, i32) {
    %c0_i32 = arith.constant 0 : i32
    %c0_i32_0 = arith.constant 0 : i32
    return %c0_i32, %arg1 : i32, i32
  }
  func.func @transform_9(%arg0: i32, %arg1: i32, %arg2: i32) -> (i32, i32) {
    %c0_i32 = arith.constant 0 : i32
    %c0_i32_0 = arith.constant 0 : i32
    return %c0_i32, %arg1 : i32, i32
  }
  func.func @transform_10(%arg0: i32, %arg1: i32, %arg2: i32) -> (i32, i32) {
    %c0_i32 = arith.constant 0 : i32
    %c0_i32_0 = arith.constant 0 : i32
    return %c0_i32, %arg1 : i32, i32
  }
  func.func @transform_11(%arg0: i32, %arg1: i32, %arg2: i32) -> (i32, i32) {
    %c0_i32 = arith.constant 0 : i32
    return %arg0, %arg1 : i32, i32
  }
  func.func @transform_12(%arg0: i32, %arg1: i32, %arg2: i32) -> (i32, i32) {
    %c0_i32 = arith.constant 0 : i32
    return %arg0, %arg1 : i32, i32
  }
}

</mosaic_0001>

<bundles_post_ra>
// kernel: tpu_custom_call.1
= control target key start
LH: loop header
LB: loop body
LE: loop exit
PB: predicated region body
PF: predicated region fallthrough
CT: control target
= control target key end

     0   :  { %s3350_s0 = inlined_call_operand.hbm [shape: f32[16,256], index: 0, kind: input, shape index: {}]   ;;  %s3351_s1 = inlined_call_operand.hbm [shape: f32[256,256], index: 1, kind: input, shape index: {}]   ;;  %s3352_s2 = inlined_call_operand.hbm [shape: f32[256,256], index: 2, kind: input, shape index: {}]   ;;  %s3353_s3 = inlined_call_operand.hbm [shape: f32[256,256], index: 3, kind: input, shape index: {}]   ;;  %s3354_s4 = inlined_call_operand.hbm [shape: f32[256,256], index: 4, kind: input, shape index: {}]   ;;  %s3355_s5 = inlined_call_operand.hbm [shape: f32[256,256], index: 5, kind: input, shape index: {}]   ;;  %s3356_s6 = inlined_call_operand.vmem [shape: f32[1,256], index: 6, kind: input, shape index: {}]   ;;  %s3357_s7 = inlined_call_operand.vmem [shape: f32[1,256], index: 7, kind: input, shape index: {}]   ;;  %s3358_s8 = inlined_call_operand.vmem [shape: f32[1,256], index: 8, kind: input, shape index: {}]   ;;  %s3359_s9 = inlined_call_operand.vmem [shape: f32[1,256], index: 9, kind: input, shape index: {}]   ;;  %s3360_s10 = inlined_call_operand.vmem [shape: f32[1,256], index: 10, kind: input, shape index: {}]   ;;  %s3361_s11 = inlined_call_operand.hbm [shape: f32[16,256], index: 11, kind: output, shape index: {0}]   ;;  %s3362_s12 = inlined_call_operand.hbm [shape: f32[16,256], index: 12, kind: output, shape index: {1}]  }
   0x1   :  { %3406 = sst [smem:[#allocation46_spill]] %s3350_s0 }
   0x2   :  { %3407 = sst [smem:[#allocation47_spill]] %s3351_s1 }
   0x3   :  { %3408 = sst [smem:[#allocation48_spill]] %s3352_s2 }
   0x4   :  { %3409 = sst [smem:[#allocation49_spill]] %s3353_s3 }
   0x5   :  { %3410 = sst [smem:[#allocation50_spill]] %s3354_s4 }
   0x6   :  { %3411 = sst [smem:[#allocation51_spill]] %s3355_s5 }
   0x7   :  { %3412 = sst [smem:[#allocation52_spill]] %s3356_s6 }
   0x8   :  { %3413 = sst [smem:[#allocation53_spill]] %s3357_s7 }
   0x9   :  { %3414 = sst [smem:[#allocation54_spill]] %s3358_s8 }
   0xa   :  { %3415 = sst [smem:[#allocation55_spill]] %s3359_s9 }
   0xb   :  { %3416 = sst [smem:[#allocation56_spill]] %s3360_s10 }
   0xc   :  { %3417 = sst [smem:[#allocation57_spill]] %s3361_s11 }
   0xd   :  { %3418 = sst [smem:[#allocation58_spill]] %s3362_s12 }
   0xe   :  { %18 = vsyncpa [#allocation3], 0 }
   0xf   :  { %20 = vsyncpa [#allocation3 + $0x1], 0 }
  0x10   :  { %21 = vsyncpa [#allocation6], 0 }
  0x11   :  { %23 = vsyncpa [#allocation6 + $0x1], 0 }
  0x12   :  { %24 = vsyncpa [#allocation9], 0 }
  0x13   :  { %26 = vsyncpa [#allocation9 + $0x1], 0 }
  0x14   :  { %27 = vsyncpa [#allocation12], 0 }
  0x15   :  { %29 = vsyncpa [#allocation12 + $0x1], 0 }
  0x16   :  { %30 = vsyncpa [#allocation4], 0 }
  0x17   :  { %32 = vsyncpa [#allocation4 + $0x1], 0 }
  0x18   :  { %33 = vsyncpa [#allocation15], 0 }
  0x19   :  { %35 = vsyncpa [#allocation15 + $0x1], 0  ;;  %s2471_s21 = smov 0   ;;  %s2473_s22 = smov 0  }
  0x1a   :  { %s2475_s23 = smov 0   ;;  %s2477_s24 = smov 0  }
  0x1b   :  { %s2479_s25 = smov 0   ;;  %s2481_s26 = smov 0  }
  0x1c   :  { %s2483_s27 = smov 0   ;;  %s2485_s28 = smov 0  }
  0x1d   :  { %s2487_s29 = smov 0   ;;  %s2489_s30 = smov 0  }
  0x1e   :  { %s2491_s13 = smov 0   ;;  %s2493_s14 = smov 0  }
  0x1f   :  { %s2495_s15 = smov 0   ;;  %s2497_s16 = smov 0  }
  0x20   :  { %s2499_s17 = smov 0   ;;  %s2501_s18 = smov 0  }
  0x21 LB: > { %3419 = sst [smem:[#allocation22_spill]] %s2329_s21  ;;  %p3371_p0 = scmp.eq.s32.totalorder %s2389_s18, 0  ;;  %s2389_s18 = sphi %s2501_s18, %s41_s18   ;;  %s2385_s17 = sphi %s2499_s17, %s3517_s17   ;;  %s2381_s16 = sphi %s2497_s16, %s3516_s16   ;;  %s2377_s15 = sphi %s2495_s15, %s3515_s15   ;;  %s2373_s14 = sphi %s2493_s14, %s3514_s14   ;;  %s2369_s13 = sphi %s2491_s13, %s3513_s13   ;;  %s2365_s30 = sphi %s2489_s30, %s3512_s30   ;;  %s2361_s29 = sphi %s2487_s29, %s3511_s29   ;;  %s2357_s28 = sphi %s2485_s28, %s3510_s28   ;;  %s2353_s27 = sphi %s2483_s27, %s3509_s27   ;;  %s2349_s26 = sphi %s2481_s26, %s3508_s26   ;;  %s2345_s25 = sphi %s2479_s25, %s3507_s25   ;;  %s2341_s24 = sphi %s2477_s24, %s3506_s24   ;;  %s2337_s23 = sphi %s2475_s23, %s3505_s23   ;;  %s2333_s22 = sphi %s2473_s22, %s3504_s22   ;;  %s2329_s21 = sphi %s2471_s21, %s3503_s21  }
  0x22   : > { %3420 = sst [smem:[#allocation23_spill]] %s2333_s22  ;;  %p104_p1 = scmp.ne.s32.totalorder %s2349_s26, %s2345_s25 }
  0x23   : > { %3421 = sst [smem:[#allocation24_spill]] %s2337_s23  ;;  %p3370_p2 = scmp.lt.s32.totalorder %s2389_s18, 8 }
  0x24   : > { %3422 = sst [smem:[#allocation25_spill]] %s2345_s25  ;;  %p106_p3 = por %p104_p1, %p3371_p0 }
  0x25   : > { %3423 = sst [smem:[#allocation26_spill]] %s2349_s26  ;;  %s3369_s19 = sand.u32 1, %s2389_s18  }
  0x26   : > { %3424 = sst [smem:[#allocation27_spill]] %s2357_s28  ;;  %s3365_s20 = sand.u32 1, %s2349_s26  }
  0x27   : > { %3425 = sst [smem:[#allocation28_spill]] %s2361_s29  ;;  %s2561_s12 = sshll.u32 %s3365_s20, 7 }
  0x28   : > { %3426 = sst [smem:[#allocation29_spill]] %s2365_s30  ;;  %s1637_s11 = sshll.u32 %s2381_s16, 5 }
  0x29   : > { %3427 = sst [smem:[#allocation30_spill]] %s2369_s13  ;;  %s456_s10 = scalar_lea.vmem [#allocation5], %s2561_s12 }
  0x2a   : > { %3428 = sst [smem:[#allocation31_spill]] %s2373_s14  ;;  %s462_s14 = sadd.s32 %s2377_s15, %s1637_s11 }
  0x2b   : > { %3429 = sst [smem:[#allocation32_spill]] %s2377_s15  ;;  %s2565_s30 = sshll.u32 %s462_s14, 7 }
  0x2c   : > { %3430 = sst [smem:[#allocation33_spill]] %s2381_s16  ;;  %s465_s9 = sshll.u32 %s456_s10, 4  ;;  %s2574_s9 = int_to_ptr.vmem [resolvable:$true] %s465_s9 }
  0x2d   : > { %3431 = sst [smem:[#allocation34_spill]] %s2385_s17  ;;  %s3432_s1 = sld [smem:[#allocation47_spill]] }
  0x2e   : > { %p2578_p4 = pnand %p3370_p2, %p106_p3  ;;  %s2585_s10 = scalar_lea.sflag [#allocation6], %s3369_s19 }
  0x2f   : > { %3434 = sst [smem:[#allocation35_spill]] %s2585_s10 }
  0x30   : > { %s3433_s20 = scalar_select %p2578_p4, 1, 0 }
  0x31   : > { %p2591_p7 = pneg %p2578_p4 }
  0x33   : > { %s2572_s6 = scalar_lea.hbm %s3432_s1, %s2565_s30  ;;  %s2008_s13 = scalar_lea.hbm %s3432_s1, 8192 }
  0x34   : > { %s2003_s11 = scalar_lea.hbm %s2572_s6, 2048  ;;  %p2009_p10 = scmp.lt.u32.totalorder %s2572_s6, %s3432_s1 }
  0x35   : > { %p2004_p6 = scmp.ne.s32.totalorder %s2572_s6, %s2003_s11  ;;  %p2010_p11 = scmp.lt.u32.totalorder %s2008_s13, %s2003_s11 }
  0x36   : > { %p2012_p13 = scmp.lt.u32.totalorder %s2003_s11, %s2572_s6 }
  0x37   : > { %p2006_p8 = pnand %p2591_p7, %p2004_p6  ;;  %p2011_p12 = por %p2010_p11, %p2009_p10 }
  0x39   : > { %p2007_p9 = pneg %p2006_p8  ;;  %p2013_p1 = por %p2012_p13, %p2011_p12 }
  0x3b   : > { %p2014_p3 = pnand %p2013_p1, %p2007_p9 }
  0x3d   : > { %2017 = shalt.err (!%p2014_p3)
}
  0x3e   : > { %s2018_s19 = scalar_lea.vmem %s2574_s9, 2048  ;;  %s2391_s8 = smov [#allocation5]  }
  0x3f   : > { %p2019_p6 = scmp.ne.s32.totalorder %s2574_s9, %s2018_s19  ;;  %s2023_s14 = sshll.u32 %s2391_s8, 4  ;;  %s2024_s14 = int_to_ptr.vmem [resolvable:$false] %s2023_s14 }
  0x40   : > { %s2025_s4 = scalar_lea.vmem %s2024_s14, 4096  ;;  %p2026_p0 = scmp.lt.s32.totalorder %s2574_s9, %s2024_s14 }
  0x41   : > { %p2021_p8 = pnand %p2019_p6, %p2591_p7  ;;  %p2027_p5 = scmp.lt.s32.totalorder %s2025_s4, %s2018_s19 }
  0x43   : > { %p2022_p2 = pneg %p2021_p8  ;;  %p2028_p10 = por %p2027_p5, %p2026_p0 }
  0x45   : > { %p2029_p11 = pnand %p2028_p10, %p2022_p2 }
  0x47   : > { %2032 = shalt.err (!%p2029_p11)
}
  0x48   : > { %s3373_s5 = smov 256   ;;  %s3375_s13 = smov 128  }
  0x49   : > { %s3377_s11 = smov 8   ;;  %p595_p0 = scmp.lt.s32.totalorder %s2389_s18, 9 }
  0x4a   : > { %1744 = dma.hbm_to_vmem [thread:$0]  (!%p2578_p4), %s2572_s6, 2048, %s2574_s9, %s2585_s10, %s3373_s5, %s3375_s13, %s3377_s11  }
  0x4b   : > { %s3436_s3 = sld [smem:[#allocation49_spill]]  ;;  %p3437_p2 = scmp.ge.s32.totalorder %s2389_s18, 1 }
  0x4c   : > { %s502_s1 = scalar_lea.vmem [#allocation8], %s2561_s12  ;;  %s3440_s6 = sand.u32 1, %s2389_s18  }
  0x4d   : > { %p2627_p5 = pnand %p3437_p2, %p595_p0  ;;  %s511_s2 = sshll.u32 %s502_s1, 4  ;;  %s2632_s2 = int_to_ptr.vmem [resolvable:$true] %s511_s2 }
  0x4e   : > { %s2636_s9 = scalar_lea.sflag [#allocation9], %s3440_s6 }
  0x4f   : > { %s3438_s4 = scalar_select %p2627_p5, 1, 0 }
  0x50   : > { %3441 = sst [smem:[#allocation37_spill]] %s2636_s9 }
  0x51   : > { %s2623_s14 = scalar_lea.hbm %s3436_s3, %s2565_s30  ;;  %3439 = sst [smem:[#allocation36_spill]] %s3438_s4 }
  0x52   : > { %s2033_s5 = scalar_lea.hbm %s2623_s14, 2048  ;;  %s2038_s13 = scalar_lea.hbm %s3436_s3, 8192 }
  0x53   : > { %p2034_p9 = scmp.ne.s32.totalorder %s2623_s14, %s2033_s5  ;;  %p2039_p1 = scmp.lt.u32.totalorder %s2623_s14, %s3436_s3 }
  0x54   : > { %p2040_p3 = scmp.lt.u32.totalorder %s2038_s13, %s2033_s5  ;;  %p2042_p8 = scmp.lt.u32.totalorder %s2033_s5, %s2623_s14 }
  0x55   : > { %p2036_p12 = pnand %p2034_p9, %p2591_p7 }
  0x56   : > { %p2041_p6 = por %p2040_p3, %p2039_p1 }
  0x57   : > { %p2037_p13 = pneg %p2036_p12 }
  0x58   : > { %p2043_p10 = por %p2042_p8, %p2041_p6 }
  0x5a   : > { %p2044_p11 = pnand %p2043_p10, %p2037_p13 }
  0x5c   : > { %2047 = shalt.err (!%p2044_p11)
}
  0x5d   : > { %s2048_s1 = scalar_lea.vmem %s2632_s2, 2048  ;;  %s2395_s6 = smov [#allocation8]  }
  0x5e   : > { %p2049_p0 = scmp.ne.s32.totalorder %s2632_s2, %s2048_s1  ;;  %s2053_s19 = sshll.u32 %s2395_s6, 4  ;;  %s2054_s19 = int_to_ptr.vmem [resolvable:$false] %s2053_s19 }
  0x5f   : > { %s2055_s10 = scalar_lea.vmem %s2054_s19, 4096  ;;  %p2056_p12 = scmp.lt.s32.totalorder %s2632_s2, %s2054_s19 }
  0x60   : > { %p2051_p2 = pnand %p2049_p0, %p2591_p7  ;;  %p2057_p5 = scmp.lt.s32.totalorder %s2055_s10, %s2048_s1 }
  0x62   : > { %p2052_p9 = pneg %p2051_p2  ;;  %p2058_p1 = por %p2057_p5, %p2056_p12 }
  0x64   : > { %p2059_p3 = pnand %p2058_p1, %p2052_p9 }
  0x66   : > { %2062 = shalt.err (!%p2059_p3)
}
  0x67   : > { %s3442_s5 = smov 8   ;;  %s3443_s13 = smov 128  }
  0x68   : > { %s3444_s11 = smov 256   ;;  %s2664_s8 = sadd.s32 4294967295, %s2389_s18  }
  0x69   : > { %1750 = dma.hbm_to_vmem [thread:$0]  (!%p2578_p4), %s2623_s14, 2048, %s2632_s2, %s2636_s9, %s3444_s11, %s3443_s13, %s3442_s5  }
  0x6a   : > { %s53_s6 = sadd.s32 1, %s2377_s15  ;;  %s56_s19 = sadd.s32 1, %s2381_s16 }
  0x6b   : > { %p54_p5 = scmp.ge.s32.totalorder %s53_s6, 2  ;;  %s60_s10 = sadd.s32 1, %s2385_s17 }
  0x6c   : > { %s69_s3 = sadd.s32 1, %s2361_s29  ;;  %p76_p13 = scmp.ne.s32.totalorder %s2361_s29, %s2357_s28 }
  0x6d   : > { %s3519_s6 = smov (%p54_p5, %s53_s6), 0  ;;  %s3521_s19 = smov (!%p54_p5, %s56_s19), %s2381_s16 }
  0x6e   : > { %3445 = sst [smem:[#allocation38_spill]] %s3519_s6  ;;  %s65_s4 = ssub.s32 %s2377_s15, %s3519_s6 }
  0x6f   : > { %p58_p6 = scmp.ge.s32.totalorder %s3521_s19, 2  ;;  %p82_p8 = scmp.ne.s32.totalorder %s2357_s28, %s2353_s27 }
  0x70   : > { %p3446_p10 = scmp.eq.s32.totalorder %s2389_s18, 0  ;;  %p83_p0 = scmp.eq.s32.totalorder %s2664_s8, 0 }
  0x71   : > { %s3523_s19 = smov (%p58_p6, %s3521_s19), 0  ;;  %s3525_s10 = smov (!%p58_p6, %s60_s10), %s2385_s17 }
  0x72   : > { %p2682_p11 = por %p3446_p10, %p76_p13  ;;  %3448 = sst [smem:[#allocation39_spill]] %s3523_s19 }
  0x73   : > { %p2692_p2 = por %p83_p0, %p82_p8  ;;  %s92_s1 = ssub.s32 %s2381_s16, %s3523_s19 }
  0x74   : > { %p62_p9 = scmp.ge.s32.totalorder %s3525_s10, 2  ;;  %s94_s27 = sor.u32 %s92_s1, %s65_s4 }
  0x75   : > { %s3449_s14 = scalar_select %p2692_p2, 1, 0 }
  0x76   : > { %p95_p12 = scmp.eq.s32.totalorder %s94_s27, 0  ;;  %s97_s6 = sadd.s32 1, %s2349_s26 }
  0x77   : > { %3450 = sst [smem:[#allocation40_spill]] %s3449_s14  ;;  %s3527_s10 = smov (%p62_p9, %s3525_s10), 0 }
  0x78   : > { %3451 = sst [smem:[#allocation41_spill]] %s3527_s10  ;;  %s64_s14 = ssub.s32 %s2385_s17, %s3527_s10 }
  0x79   : > { %s2702_s28 = scalar_select %p95_p12, %s2349_s26, %s97_s6  }
  0x7a   : > { %p110_p1 = scmp.ne.s32.totalorder %s2345_s25, %s2341_s24  ;;  %s66_s19 = sor.u32 %s65_s4, %s64_s14 }
  0x7b   : > { %3452 = sst [smem:[#allocation42_spill]] %s2702_s28  ;;  %s364_s16 = sor.u32 %s92_s1, %s64_s14 }
  0x7c   : > { %p67_p3 = scmp.eq.s32.totalorder %s66_s19, 0  ;;  %p2710_p5 = por %p110_p1, %p83_p0 }
  0x7d   : > { %p365_p13 = scmp.eq.s32.totalorder %s364_s16, 0  ;;  %s367_s9 = sadd.s32 1, %s2337_s23 }
  0x7e   : > { %s3453_s27 = scalar_select %p2710_p5, 1, 0 }
  0x7f   : > { %s2716_s11 = scalar_select %p67_p3, %s2361_s29, %s69_s3  }
  0x80   : > { %s2719_s13 = scalar_select %p365_p13, %s2337_s23, %s367_s9  }
  0x81   : > { %3454 = sst [smem:[#allocation43_spill]] %s2716_s11  ;;  %p377_p6 = scmp.ne.s32.totalorder %s2337_s23, %s2333_s22 }
  0x82   : > { %3455 = sst [smem:[#allocation44_spill]] %s2719_s13  ;;  %p378_p8 = scmp.eq.s32.totalorder %s2664_s8, 7 }
  0x83   : > { %p383_p10 = scmp.ne.s32.totalorder %s2333_s22, %s2329_s21  ;;  %s3456_s24 = sadd.s32 4294967294, %s2389_s18  }
  0x84   : > { %p384_p9 = scmp.eq.s32.totalorder %s3456_s24, 7  ;;  %p2728_p12 = por %p378_p8, %p377_p6 }
  0x85   : > { %s432_s1 = sand.u32 1, %s2361_s29   ;;  %s1579_s9 = sshll.u32 %s2385_s17, 1 }
  0x86   : > { %s3457_s4 = scalar_select %p2728_p12, 1, 0 }
  0x87   : > { %p2733_p0 = por %p384_p9, %p383_p10  ;;  %s1578_s3 = sshll.u32 %s432_s1, 3 }
  0x88   : > { %s441_s6 = sadd.s32 %s2377_s15, %s1579_s9  ;;  %s436_s14 = scalar_lea.vmem [#allocation2], %s1578_s3 }
  0x89   : > { %s3458_s16 = scalar_select %p2733_p0, 1, 0 }
  0x8a   : > { %s1580_s19 = sshll.u32 %s441_s6, 7  ;;  %s445_s10 = sshll.u32 %s436_s14, 4  ;;  %s2744_s10 = int_to_ptr.vmem [resolvable:$true] %s445_s10 }
  0x8b   : > { %3459 = sst [smem:[#allocation45_spill]] %s3458_s16  ;;  %s3460_s0 = sld [smem:[#allocation46_spill]] }
  0x8c   : > { %p3461_p1 = scmp.lt.s32.totalorder %s2389_s18, 8  ;;  %s3463_s6 = sld [smem:[#allocation48_spill]] }
  0x8d   : > { %s479_s11 = scalar_lea.vmem [#allocation7], %s2561_s12  ;;  %s433_s14 = scalar_lea.sflag [#allocation3], %s432_s1 }
  0x8e   : > { %p2750_p3 = pnand %p3461_p1, %p2682_p11 }
  0x90   : > { %p2065_p6 = pneg %p2750_p3 }
  0x91   : > { %s2742_s13 = scalar_lea.hbm %s3460_s0, %s1580_s19  ;;  %s488_s19 = sshll.u32 %s479_s11, 4  ;;  %s2761_s19 = int_to_ptr.vmem [resolvable:$true] %s488_s19 }
  0x92   : > { %s2758_s28 = scalar_lea.hbm %s3463_s6, %s2565_s30  ;;  %s2063_s17 = scalar_lea.hbm %s2742_s13, 128 }
  0x93   : > { %p2064_p13 = scmp.ne.s32.totalorder %s2742_s13, %s2063_s17  ;;  %s2068_s9 = scalar_lea.hbm %s3460_s0, 512 }
  0x94   : > { %p2069_p10 = scmp.lt.u32.totalorder %s2742_s13, %s3460_s0  ;;  %p2070_p9 = scmp.lt.u32.totalorder %s2068_s9, %s2063_s17 }
  0x95   : > { %p2066_p11 = pnand %p2065_p6, %p2064_p13  ;;  %p2072_p0 = scmp.lt.u32.totalorder %s2063_s17, %s2742_s13 }
  0x96   : > { %p2071_p1 = por %p2070_p9, %p2069_p10 }
  0x97   : > { %p2067_p8 = pneg %p2066_p11 }
  0x98   : > { %p2073_p12 = por %p2072_p0, %p2071_p1 }
  0x9a   : > { %p2074_p5 = pnand %p2073_p12, %p2067_p8 }
  0x9c   : > { %2077 = shalt.err (!%p2074_p5)
}
  0x9d   : > { %s2078_s1 = scalar_lea.vmem %s2744_s10, 128  ;;  %s2396_s15 = smov [#allocation2]  }
  0x9e   : > { %p2079_p13 = scmp.ne.s32.totalorder %s2744_s10, %s2078_s1  ;;  %s2083_s11 = sshll.u32 %s2396_s15, 4  ;;  %s2084_s11 = int_to_ptr.vmem [resolvable:$false] %s2083_s11 }
  0x9f   : > { %s2085_s29 = scalar_lea.vmem %s2084_s11, 256  ;;  %p2086_p4 = scmp.lt.s32.totalorder %s2744_s10, %s2084_s11 }
  0xa0   : > { %p2081_p11 = pnand %p2079_p13, %p2065_p6  ;;  %p2087_p10 = scmp.lt.s32.totalorder %s2085_s29, %s2078_s1 }
  0xa2   : > { %p2082_p2 = pneg %p2081_p11  ;;  %p2088_p9 = por %p2087_p10, %p2086_p4 }
  0xa4   : > { %p2089_p0 = pnand %p2088_p9, %p2082_p2 }
  0xa6   : > { %2092 = shalt.err (!%p2089_p0)
}
  0xa7   : > { %1741 = dma.hbm_to_vmem [thread:$0]  (!%p2750_p3), %s2742_s13, 128, %s2744_s10, %s433_s14  }
  0xa8   : > { %s2093_s17 = scalar_lea.hbm %s2758_s28, 2048  ;;  %s2098_s3 = scalar_lea.hbm %s3463_s6, 8192 }
  0xa9   : > { %p2094_p5 = scmp.ne.s32.totalorder %s2758_s28, %s2093_s17  ;;  %p2099_p4 = scmp.lt.u32.totalorder %s2758_s28, %s3463_s6 }
  0xaa   : > { %p2100_p2 = scmp.lt.u32.totalorder %s2098_s3, %s2093_s17  ;;  %p2102_p1 = scmp.lt.u32.totalorder %s2093_s17, %s2758_s28 }
  0xab   : > { %p2096_p12 = pnand %p2094_p5, %p2591_p7 }
  0xac   : > { %p2101_p8 = por %p2100_p2, %p2099_p4 }
  0xad   : > { %p2097_p6 = pneg %p2096_p12 }
  0xae   : > { %p2103_p13 = por %p2102_p1, %p2101_p8 }
  0xb0   : > { %p2104_p11 = pnand %p2103_p13, %p2097_p6 }
  0xb2   : > { %2107 = shalt.err (!%p2104_p11)
}
  0xb3   : > { %s2108_s13 = scalar_lea.vmem %s2761_s19, 2048  ;;  %s2397_s10 = smov [#allocation7]  }
  0xb4   : > { %p2109_p3 = scmp.ne.s32.totalorder %s2761_s19, %s2108_s13  ;;  %s2113_s24 = sshll.u32 %s2397_s10, 4  ;;  %s2114_s24 = int_to_ptr.vmem [resolvable:$false] %s2113_s24 }
  0xb5   : > { %s2115_s14 = scalar_lea.vmem %s2114_s24, 4096  ;;  %p2116_p0 = scmp.lt.s32.totalorder %s2761_s19, %s2114_s24 }
  0xb6   : > { %p2111_p10 = pnand %p2109_p3, %p2591_p7  ;;  %p2117_p5 = scmp.lt.s32.totalorder %s2115_s14, %s2108_s13 }
  0xb8   : > { %p2112_p9 = pneg %p2111_p10  ;;  %p2118_p12 = por %p2117_p5, %p2116_p0 }
  0xba   : > { %p2119_p4 = pnand %p2118_p12, %p2112_p9 }
  0xbc   : > { %2122 = shalt.err (!%p2119_p4)
}
  0xbd   : > { %p3464_p6 = scmp.ne.s32.totalorder %s3433_s20, 0  ;;  %s3465_s11 = smov 128  }
  0xbe   : > { %s3466_s29 = smov 256   ;;  %s3467_s17 = sld [smem:[#allocation35_spill]] }
  0xbf   : > { %s3468_s3 = sld [smem:[#allocation50_spill]]  ;;  %s525_s15 = scalar_lea.vmem [#allocation10], %s2561_s12 }
  0xc0   : > { %s534_s13 = sshll.u32 %s525_s15, 4  ;;  %s2820_s13 = int_to_ptr.vmem [resolvable:$true] %s534_s13 }
  0xc4   : > { %1747 = dma.hbm_to_vmem [thread:$0]  (!%p3464_p6), %s2758_s28, 2048, %s2761_s19, %s3467_s17, %s3466_s29, %s3465_s11, %s3442_s5  }
  0xc5   : > { %s2817_s1 = scalar_lea.hbm %s3468_s3, %s2565_s30  ;;  %s2128_s19 = scalar_lea.hbm %s3468_s3, 8192 }
  0xc6   : > { %s2123_s10 = scalar_lea.hbm %s2817_s1, 2048  ;;  %p2129_p13 = scmp.lt.u32.totalorder %s2817_s1, %s3468_s3 }
  0xc7   : > { %p2124_p2 = scmp.ne.s32.totalorder %s2817_s1, %s2123_s10  ;;  %p2130_p11 = scmp.lt.u32.totalorder %s2128_s19, %s2123_s10 }
  0xc8   : > { %p2132_p10 = scmp.lt.u32.totalorder %s2123_s10, %s2817_s1 }
  0xc9   : > { %p2126_p8 = pnand %p2124_p2, %p2591_p7  ;;  %p2131_p3 = por %p2130_p11, %p2129_p13 }
  0xcb   : > { %p2127_p1 = pneg %p2126_p8  ;;  %p2133_p9 = por %p2132_p10, %p2131_p3 }
  0xcd   : > { %p2134_p0 = pnand %p2133_p9, %p2127_p1 }
  0xcf   : > { %2137 = shalt.err (!%p2134_p0)
}
  0xd0   : > { %s2138_s2 = scalar_lea.vmem %s2820_s13, 2048  ;;  %s2398_s9 = smov [#allocation10]  }
  0xd1   : > { %p2139_p5 = scmp.ne.s32.totalorder %s2820_s13, %s2138_s2  ;;  %s2143_s15 = sshll.u32 %s2398_s9, 4  ;;  %s2144_s15 = int_to_ptr.vmem [resolvable:$false] %s2143_s15 }
  0xd2   : > { %s2145_s24 = scalar_lea.vmem %s2144_s15, 4096  ;;  %p2146_p2 = scmp.lt.s32.totalorder %s2820_s13, %s2144_s15 }
  0xd3   : > { %p2141_p12 = pnand %p2139_p5, %p2591_p7  ;;  %p2147_p8 = scmp.lt.s32.totalorder %s2145_s24, %s2138_s2 }
  0xd5   : > { %p2142_p4 = pneg %p2141_p12  ;;  %p2148_p13 = por %p2147_p8, %p2146_p2 }
  0xd7   : > { %p2149_p11 = pnand %p2148_p13, %p2142_p4 }
  0xd9   : > { %2152 = shalt.err (!%p2149_p11)
}
  0xda   : > { %s3469_s10 = sld [smem:[#allocation37_spill]]  ;;  %s3470_s14 = sld [smem:[#allocation51_spill]] }
  0xdb   : > { %s548_s2 = scalar_lea.vmem [#allocation11], %s2561_s12  ;;  %s3472_s24 = sand.u32 1, %s2349_s26  }
  0xdc   : > { %s557_s15 = sshll.u32 %s548_s2, 4  ;;  %s2858_s0 = scalar_lea.sflag [#allocation12], %s3472_s24  ;;  %s2854_s15 = int_to_ptr.vmem [resolvable:$true] %s557_s15 }
  0xe0   : > { %1753 = dma.hbm_to_vmem [thread:$0]  (!%p3464_p6), %s2817_s1, 2048, %s2820_s13, %s3469_s10, %s3466_s29, %s3465_s11, %s3442_s5  }
  0xe1   : > { %s3471_s9 = smov %s3470_s14  ;;  %s2851_s17 = scalar_lea.hbm %s3470_s14, %s2565_s30 }
  0xe2   : > { %s2153_s3 = scalar_lea.hbm %s2851_s17, 2048  ;;  %s2158_s30 = scalar_lea.hbm %s3471_s9, 8192 }
  0xe3   : > { %p2154_p1 = scmp.ne.s32.totalorder %s2851_s17, %s2153_s3  ;;  %p2159_p9 = scmp.lt.u32.totalorder %s2851_s17, %s3471_s9 }
  0xe4   : > { %p2160_p0 = scmp.lt.u32.totalorder %s2158_s30, %s2153_s3  ;;  %p2162_p12 = scmp.lt.u32.totalorder %s2153_s3, %s2851_s17 }
  0xe5   : > { %p2156_p3 = pnand %p2154_p1, %p2591_p7 }
  0xe6   : > { %p2161_p5 = por %p2160_p0, %p2159_p9 }
  0xe7   : > { %p2157_p10 = pneg %p2156_p3 }
  0xe8   : > { %p2163_p4 = por %p2162_p12, %p2161_p5 }
  0xea   : > { %p2164_p2 = pnand %p2163_p4, %p2157_p10 }
  0xec   : > { %2167 = shalt.err (!%p2164_p2)
}
  0xed   : > { %s2168_s12 = scalar_lea.vmem %s2854_s15, 2048  ;;  %s2399_s19 = smov [#allocation11]  }
  0xee   : > { %p2169_p8 = scmp.ne.s32.totalorder %s2854_s15, %s2168_s12  ;;  %s2173_s14 = sshll.u32 %s2399_s19, 4  ;;  %s2174_s14 = int_to_ptr.vmem [resolvable:$false] %s2173_s14 }
  0xef   : > { %s2175_s2 = scalar_lea.vmem %s2174_s14, 4096  ;;  %p2176_p1 = scmp.lt.s32.totalorder %s2854_s15, %s2174_s14 }
  0xf0   : > { %p2171_p13 = pnand %p2169_p8, %p2591_p7  ;;  %p2177_p3 = scmp.lt.s32.totalorder %s2175_s2, %s2168_s12 }
  0xf2   : > { %p2172_p11 = pneg %p2171_p13  ;;  %p2178_p9 = por %p2177_p3, %p2176_p1 }
  0xf4   : > { %p2179_p0 = pnand %p2178_p9, %p2172_p11 }
  0xf6   : > { %2182 = shalt.err (!%p2179_p0)
}
  0xf7   : > { %1756 = dma.hbm_to_vmem [thread:$0]  (!%p3464_p6), %s2851_s17, 2048, %s2854_s15, %s2858_s0, %s3466_s29, %s3465_s11, %s3442_s5  }
  0xf8   : > { %s3473_s7 = sld [smem:[#allocation36_spill]] }
  0xfe   : > { %p3474_p7 = scmp.ne.s32.totalorder %s3473_s7, 0 }
  0xff   : > { %s3475_s3 = sld [smem:[#allocation27_spill]] (!%p3474_p7)  ;;  %s3476_s24 = sld [smem:[#allocation40_spill]] (!%p3474_p7) }
 0x100   : > { %599 = sbr.rel (%p3474_p7) target bundleno = 660 (0x294), region = 64 }
 0x105   : > { %s601_s1 = sand.u32 (!%p3474_p7), 1, %s3475_s3   ;;  %p3477_p10 = scmp.ne.s32.totalorder (!%p3474_p7), %s3476_s24, 0 }
 0x106   : > { %s2888_s13 = sshll.u32 (!%p3474_p7), %s601_s1, 3  ;;  %s602_s30 = scalar_lea.sflag (!%p3474_p7), [#allocation3], %s601_s1 }
 0x107   : > { %2304 = dma.done.wait (%p3477_p10), %s602_s30, 128  }
 0x108   : > { %2306 = vsyncadd (%p3477_p10), %s602_s30, 4294967168  ;;  %s610_s0 = sand.u32 1, %s2664_s8   ;;  %s612_s20 = sand.u32 1, %s2345_s25  }
 0x109   : > { %s1603_s5 = sshll.u32 %s612_s20, 7  ;;  %s611_s11 = scalar_lea.sflag [#allocation6], %s610_s0 }
 0x10a   : > { %s2897_s29 = scalar_lea.vmem [#allocation5], %s1603_s5  ;;  %p3478_p6 = scmp.ne.s32.totalorder %s3453_s27, 0 }
 0x10c   : > { %2308 = dma.done.wait (%p3478_p6), %s611_s11, 4096  }
 0x10d   : > { %2310 = vsyncadd (%p3478_p6), %s611_s11, 4294963200  ;;  %s2903_s17 = scalar_lea.vmem [#allocation7], %s1603_s5  ;;  %s629_s15 = scalar_lea.sflag [#allocation9], %s610_s0 }
 0x10e   : > { %s2905_s28 = scalar_lea.vmem [#allocation8], %s1603_s5 }
 0x10f   : > { %2312 = dma.done.wait (%p3478_p6), %s629_s15, 4096  }
 0x110   : > { %2314 = vsyncadd (%p3478_p6), %s629_s15, 4294963200  ;;  %s2911_s8 = scalar_lea.vmem [#allocation10], %s1603_s5  ;;  %s647_s12 = scalar_lea.sflag [#allocation12], %s612_s20 }
 0x111   : > { %s2913_s19 = scalar_lea.vmem [#allocation11], %s1603_s5 }
 0x112   : > { %2316 = dma.done.wait (%p3478_p6), %s647_s12, 2048  }
 0x113   : > { %2318 = vsyncadd (%p3478_p6), %s647_s12, 4294965248  ;;  %s3479_s14 = sld [smem:[#allocation30_spill]]  ;;  %s2920_s2 = sand.u32 1, %s2333_s22  }
 0x114   : > { %s1608_s7 = sshll.u32 %s2920_s2, 3  ;;  %s3480_s1 = sld [smem:[#allocation52_spill]] }
 0x115   : > { %s3481_s20 = sld [smem:[#allocation53_spill]]  ;;  %s3482_s12 = sld [smem:[#allocation54_spill]] }
 0x116   : > { %s3483_s26 = sld [smem:[#allocation55_spill]]  ;;  %s3484_s3 = sld [smem:[#allocation56_spill]] }
 0x117   : > { %s2947_s16 = scalar_lea.vmem [#allocation13], %s1608_s7  ;;  %s2949_s21 = scalar_lea.vmem [#allocation14], %s1608_s7 }
 0x119   : > { %p741_p5 = scmp.lt.s32.totalorder %s3479_s14, 1 }
 0x11b   : > { %s3529_s14 = smov (!%p741_p5, %s3479_s14), 1 }
 0x11c   : > { %s743_s27 = scalar_lea.vmem %s3480_s1, %s3529_s14  ;;  %s746_s5 = scalar_lea.vmem %s3481_s20, %s3529_s14 }
 0x11d   : > { %s749_s10 = scalar_lea.vmem %s3482_s12, %s3529_s14  ;;  %s752_s25 = scalar_lea.vmem %s3483_s26, %s3529_s14 }
 0x11e   : > { %s755_s24 = scalar_lea.vmem %s3484_s3, %s3529_s14  ;;  %s3485_s1 = sld [smem:[#allocation29_spill]] }
 0x124   : > { %p1610_p12 = scmp.ne.s32.totalorder %s3485_s1, 0 }
 0x125   : > { %v2400_v0 = vmov (!%p1610_p12), 0.0  }
 0x126   : > { %759 = sbr.rel (%p1610_p12) target bundleno = 301 (0x12d), region = 92  ;;  %760 = vst [vmem:[%s2947_s16] sm:$0xff] (!%p1610_p12), %v2400_v0  ;;  %761 = vst [vmem:[%s2949_s21] sm:$0xff] (!%p1610_p12), %v2400_v0 }
 0x12d PF: > { %v778_v1 = vld [vmem:[%s2903_s17] sm:$0xff]  ;;  %v2401_v2 = vmov 0.0|0.0   ;;  %v779_v4 = vld [vmem:[%s2903_s17 + $0x8] sm:$0xff]  ;;  %vm2402_vm0 = vmmov 0   ;;  %v2403_v5 = vmov 0.0   ;;  %v780_v15 = vld [vmem:[%s2903_s17 + $0x10] sm:$0xff] }
 0x12e   : > { %1694 = vmatprep.subr.bf16.mxu0 %v2401_v2  ;;  %v762_v3 = vld [vmem:[%s2897_s29] sm:$0xff]  ;;  %1901 = vrcp.f32 %v778_v1  ;;  %1691 = vmatprep.mubr.msk.f32.mxu0 %vm2402_vm0, %v2403_v5  ;;  %v811_v7 = vld [vmem:[%s2913_s19 + $0x8] sm:$0xff]  ;;  %v2965_v16 = vld [vmem:[%s2903_s17 + $0x18] sm:$0xff]  ;;  %v1028_v39 = vmul.f32 %v778_v1, %v778_v1  ;;  %v1029_v48 = vmul.f32 %v779_v4, %v779_v4  ;;  %s3486_s22 = scalar_lea.vmem [#allocation2], %s2888_s13  ;;  %s3487_s26 = sld [smem:[#allocation29_spill]] }
 0x12f   : > { %v810_v6 = vld [vmem:[%s2913_s19] sm:$0xff]  ;;  %1903 = vrcp.f32 %v779_v4  ;;  %v763_v9 = vld [vmem:[%s2897_s29 + $0x8] sm:$0xff]  ;;  %v1077_v14 = vmul.f32 2.0, %v811_v7  ;;  %v828_v21 = vld [vmem:[%s2905_s28 + $0x10] sm:$0xff] }
 0x130   : > { %v826_v8 = vld [vmem:[%s2905_s28] sm:$0xff]  ;;  %v827_v10 = vld [vmem:[%s2905_s28 + $0x8] sm:$0xff]  ;;  %v1076_v12 = vmul.f32 2.0, %v810_v6  ;;  %v829_v22 = vld [vmem:[%s2905_s28 + $0x18] sm:$0xff]  ;;  %v844_v27 = vmul.f32 %v828_v21, %v780_v15  ;;  %1905 = vrcp.f32 %v780_v15 }
 0x131   : > { %v842_v11 = vmul.f32 %v826_v8, %v778_v1  ;;  %v843_v13 = vmul.f32 %v827_v10, %v779_v4  ;;  %v794_v17 = vld [vmem:[%s2911_s8] sm:$0xff]  ;;  %v795_v19 = vld [vmem:[%s2911_s8 + $0x8] sm:$0xff]  ;;  %v764_v24 = vld [vmem:[%s2897_s29 + $0x10] sm:$0xff]  ;;  %v845_v28 = vmul.f32 %v829_v22, %v2965_v16  ;;  %v1093_v31 = vmul.f32 %v1077_v14, %v811_v7 }
 0x132   : > { %v1092_v23 = vmul.f32 %v1076_v12, %v810_v6  ;;  %v765_v25 = vld [vmem:[%s2897_s29 + $0x18] sm:$0xff]  ;;  %v2974_v26 = vld [vmem:[%s2913_s19 + $0x10] sm:$0xff]  ;;  %v948_v30 = vsub.f32 %v794_v17, %v762_v3  ;;  %v949_v32 = vsub.f32 %v795_v19, %v763_v9  ;;  %v860_v34 = vadd.f32 %v844_v27, %v764_v24  ;;  %v2983_v37 = vld [vmem:[%s2903_s17 + $0x20] sm:$0xff] }
 0x133   : > { %v858_v18 = vadd.f32 %v842_v11, %v762_v3  ;;  %v859_v20 = vadd.f32 %v843_v13, %v763_v9  ;;  %v2978_v33 = vld [vmem:[%s2913_s19 + $0x18] sm:$0xff]  ;;  %v861_v35 = vadd.f32 %v845_v28, %v765_v25  ;;  %1907 = vrcp.f32 %v2965_v16  ;;  %v2987_v40 = vld [vmem:[%s2903_s17 + $0x28] sm:$0xff]  ;;  %v830_v41 = vld [vmem:[%s2905_s28 + $0x20] sm:$0xff] }
 0x134   : > { %v1078_v36 = vmul.f32 2.0, %v2974_v26  ;;  %1909 = vrcp.f32 %v1092_v23  ;;  %v831_v42 = vld [vmem:[%s2905_s28 + $0x28] sm:$0xff]  ;;  %v1044_v45 = vmul.f32 %v948_v30, %v948_v30  ;;  %v1079_v46 = vmul.f32 2.0, %v2978_v33  ;;  %v796_v50 = vld [vmem:[%s2911_s8 + $0x10] sm:$0xff]  ;;  %v797_v52 = vld [vmem:[%s2911_s8 + $0x18] sm:$0xff]  ;;  %p1627_p4 = scmp.ne.s32.totalorder %s3487_s26, 1 }
 0x135   : > { %v1695_v29 = vpack.c.bf16 %v859_v20, %v858_v18  ;;  %1911 = vrcp.f32 %v1093_v31  ;;  %v1045_v49 = vmul.f32 %v949_v32, %v949_v32  ;;  %v1698_v53 = vpack.c.bf16 %v861_v35, %v860_v34  ;;  %v766_v56 = vld [vmem:[%s2897_s29 + $0x20] sm:$0xff]  ;;  %v767_v57 = vld [vmem:[%s2897_s29 + $0x28] sm:$0xff]  ;;  %v832_v5 = vld [vmem:[%s2905_s28 + $0x30] sm:$0xff] }
 0x136   : > { %v1094_v51 = vmul.f32 %v1078_v36, %v2974_v26  ;;  %v846_v54 = vmul.f32 %v830_v41, %v2983_v37  ;;  %v847_v55 = vmul.f32 %v831_v42, %v2987_v40  ;;  %v3000_v58 = vld [vmem:[%s2913_s19 + $0x20] sm:$0xff]  ;;  %v1060_v59 = vadd.f32 %v1044_v45, %v1028_v39  ;;  %v3005_v63 = vld [vmem:[%s2913_s19 + $0x28] sm:$0xff]  ;;  %v833_v9 = vld [vmem:[%s2905_s28 + $0x38] sm:$0xff] }
 0x137   : > { %1696 = vmatpush3.bf16.xpose.msra.mxu0 %v1695_v29  ;;  %v950_v60 = vsub.f32 %v796_v50, %v764_v24  ;;  %v1095_v61 = vmul.f32 %v1079_v46, %v2978_v33  ;;  %v798_v62 = vld [vmem:[%s2911_s8 + $0x20] sm:$0xff]  ;;  %v1061_v0 = vadd.f32 %v1045_v49, %v1029_v48  ;;  %v951_v1 = vsub.f32 %v797_v52, %v765_v25  ;;  %v799_v4 = vld [vmem:[%s2911_s8 + $0x28] sm:$0xff]  ;;  %v3018_v14 = vld [vmem:[%s2903_s17 + $0x30] sm:$0xff] }
 0x138   : > { %v1902_v38 = vpop.eup %1901  ;;  %1697 = vmatprep.subr.bf16.mxu0 %v2401_v2  ;;  %v1030_v3 = vmul.f32 %v780_v15, %v780_v15  ;;  %v1080_v8 = vmul.f32 2.0, %v3000_v58  ;;  %v1031_v11 = vmul.f32 %v2965_v16, %v2965_v16  ;;  %v952_v12 = vsub.f32 %v798_v62, %v766_v56  ;;  %v3022_v19 = vld [vmem:[%s2903_s17 + $0x38] sm:$0xff]  ;;  %v768_v24 = vld [vmem:[%s2897_s29 + $0x30] sm:$0xff]  ;;  %v3045_v45 = vld [vmem:[%s2903_s17 + $0x40] sm:$0xff] }
 0x139   : > { %v1904_v43 = vpop.eup %1903  ;;  %v965_v44 = vmul.f32 %v1902_v38, %v810_v6  ;;  %v862_v6 = vadd.f32 %v846_v54, %v766_v56  ;;  %v1081_v13 = vmul.f32 2.0, %v3005_v63  ;;  %v953_v18 = vsub.f32 %v799_v4, %v767_v57  ;;  %v769_v30 = vld [vmem:[%s2897_s29 + $0x38] sm:$0xff]  ;;  %v3036_v34 = vld [vmem:[%s2913_s19 + $0x30] sm:$0xff]  ;;  %v834_v52 = vld [vmem:[%s2905_s28 + $0x40] sm:$0xff] }
 0x13a   : > { %v967_v47 = vmul.f32 %v1904_v43, %v811_v7  ;;  %v863_v7 = vadd.f32 %v847_v55, %v767_v57  ;;  %v1906_v10 = vpop.eup %1905  ;;  %v848_v16 = vmul.f32 %v832_v5, %v3018_v14  ;;  %v1046_v22 = vmul.f32 %v950_v60, %v950_v60  ;;  %v3039_v39 = vld [vmem:[%s2913_s19 + $0x38] sm:$0xff]  ;;  %v3063_v4 = vld [vmem:[%s2903_s17 + $0x48] sm:$0xff] }
 0x13b   : > { %1913 = vlog2.f32 %v965_v44  ;;  %v969_v17 = vmul.f32 %v1906_v10, %v2974_v26  ;;  %v1047_v23 = vmul.f32 %v951_v1, %v951_v1  ;;  %v849_v25 = vmul.f32 %v833_v9, %v3022_v19  ;;  %v801_v1 = vld [vmem:[%s2911_s8 + $0x38] sm:$0xff] }
 0x13c   : > { %1915 = vlog2.f32 %v967_v47  ;;  %v1701_v26 = vpack.c.bf16 %v863_v7, %v862_v6  ;;  %v1032_v28 = vmul.f32 %v2983_v37, %v2983_v37  ;;  %v1096_v29 = vmul.f32 %v1080_v8, %v3000_v58 }
 0x13d   : > { %1917 = vrcp.f32 %v1094_v51  ;;  %v1908_v15 = vpop.eup %1907  ;;  %v1033_v31 = vmul.f32 %v2987_v40, %v2987_v40  ;;  %v1048_v32 = vmul.f32 %v952_v12, %v952_v12  ;;  %v1049_v38 = vmul.f32 %v953_v18, %v953_v18  ;;  %v3072_v12 = vld [vmem:[%s2897_s29 + $0x48] sm:$0xff] }
 0x13e   : > { %1919 = vrcp.f32 %v2983_v37  ;;  %v1910_v20 = vpop.eup %1909  ;;  %v971_v21 = vmul.f32 %v1908_v15, %v2978_v33  ;;  %v1097_v33 = vmul.f32 %v1081_v13, %v3005_v63  ;;  %v864_v37 = vadd.f32 %v848_v16, %v768_v24 }
 0x13f   : > { %1699 = vmatpush3.bf16.xpose.msra.mxu0 %v1698_v53  ;;  %1921 = vrcp.f32 %v2987_v40  ;;  %v1912_v27 = vpop.eup %1911  ;;  %v1109_v36 = vmul.f32 %v1910_v20, %v1060_v59  ;;  %v800_v40 = vld [vmem:[%s2911_s8 + $0x30] sm:$0xff]  ;;  %v865_v44 = vadd.f32 %v849_v25, %v769_v30  ;;  %v1082_v47 = vmul.f32 2.0, %v3036_v34  ;;  %v835_v53 = vld [vmem:[%s2905_s28 + $0x48] sm:$0xff]  ;;  %v3057_v59 = vld [vmem:[%s2913_s19 + $0x40] sm:$0xff] }
 0x140   : > { %1700 = vmatprep.subr.bf16.mxu0 %v2401_v2  ;;  %1923 = vrcp.f32 %v1095_v61  ;;  %v1111_v43 = vmul.f32 %v1912_v27, %v1061_v0  ;;  %v1062_v49 = vadd.f32 %v1046_v22, %v1030_v3  ;;  %v1063_v50 = vadd.f32 %v1047_v23, %v1031_v11  ;;  %v837_v25 = vld [vmem:[%s2905_s28 + $0x58] sm:$0xff] }
 0x141   : > { %1925 = vlog2.f32 %v969_v17  ;;  %v1083_v51 = vmul.f32 2.0, %v3039_v39  ;;  %v3052_v55 = vadd.f32 %v1048_v32, %v1032_v28  ;;  %v3054_v56 = vadd.f32 %v1049_v38, %v1033_v31  ;;  %v3088_v32 = vld [vmem:[%s2903_s17 + $0x50] sm:$0xff]  ;;  %v802_v38 = vld [vmem:[%s2911_s8 + $0x40] sm:$0xff] }
 0x142   : > { %1927 = vlog2.f32 %v971_v21  ;;  %v954_v57 = vsub.f32 %v800_v40, %v768_v24  ;;  %v1704_v3 = vpack.c.bf16 %v865_v44, %v864_v37  ;;  %v1098_v7 = vmul.f32 %v1082_v47, %v3036_v34  ;;  %v836_v24 = vld [vmem:[%s2905_s28 + $0x50] sm:$0xff]  ;;  %v3099_v44 = vld [vmem:[%s2913_s19 + $0x48] sm:$0xff]  ;;  %v3105_v47 = vld [vmem:[%s2897_s29 + $0x58] sm:$0xff] }
 0x143   : > { %1929 = vrcp.f32 %v3018_v14  ;;  %v850_v8 = vmul.f32 %v834_v52, %v3045_v45  ;;  %v851_v9 = vmul.f32 %v835_v53, %v3063_v4  ;;  %v1099_v11 = vmul.f32 %v1083_v51, %v3039_v39  ;;  %v3108_v51 = vld [vmem:[%s2913_s19 + $0x50] sm:$0xff] }
 0x144   : > { %1931 = vrcp.f32 %v3022_v19  ;;  %v1084_v13 = vmul.f32 2.0, %v3057_v59  ;;  %v1034_v17 = vmul.f32 %v3018_v14, %v3018_v14  ;;  %v3079_v18 = vmul.f32 %v3022_v19, %v3022_v19 }
 0x145   : > { %v1914_v35 = vpop.eup %1913  ;;  %1933 = vrcp.f32 %v1096_v29  ;;  %v867_v14 = vadd.f32 %v851_v9, %v3072_v12  ;;  %v838_v9 = vld [vmem:[%s2905_s28 + $0x60] sm:$0xff]  ;;  %vm1234_vm1 = vcmask (!%p1627_p4), 1040384  }
 0x146   : > { %v1916_v41 = vpop.eup %1915  ;;  %v997_v42 = vmul.f32 0.6931472, %v1914_v35  ;;  %1935 = vrcp.f32 %v1097_v33  ;;  %v1100_v31 = vmul.f32 %v1084_v13, %v3057_v59  ;;  %v3091_v33 = vld [vmem:[%s2903_s17 + $0x58] sm:$0xff]  ;;  %v1036_v13 = vmul.f32 %v3045_v45, %v3045_v45 }
 0x147   : > { %v999_v46 = vmul.f32 0.6931472, %v1916_v41  ;;  %1702 = vmatpush3.bf16.xpose.msra.mxu0 %v1701_v26  ;;  %v1918_v48 = vpop.eup %1917  ;;  %1937 = vrcp.f32 %v3045_v45  ;;  %v853_v37 = vmul.f32 %v837_v25, %v3091_v33 }
 0x148   : > { %1703 = vmatprep.subr.bf16.mxu0 %v2401_v2  ;;  %v1920_v54 = vpop.eup %1919  ;;  %v1140_v61 = vadd.f32 %v1109_v36, %v997_v42  ;;  %v1113_v10 = vmul.f32 %v1918_v48, %v1062_v49  ;;  %v1050_v48 = vmul.f32 %v954_v57, %v954_v57 }
 0x149   : > { %v1922_v60 = vpop.eup %1921  ;;  %v1141_v62 = vadd.f32 %v1111_v43, %v999_v46  ;;  %v973_v0 = vmul.f32 %v1920_v54, %v3000_v58  ;;  %v770_v58 = vld [vmem:[%s2897_s29 + $0x40] sm:$0xff]  ;;  %v3102_v46 = vld [vmem:[%s2897_s29 + $0x50] sm:$0xff] }
 0x14a   : > { %v1924_v5 = vpop.eup %1923  ;;  %v975_v6 = vmul.f32 %v1922_v60, %v3005_v63  ;;  %v955_v63 = vsub.f32 %v801_v1, %v769_v30  ;;  %v1611_v20 = vadd.f32 -0.5, %v1140_v61  ;;  %v866_v28 = vadd.f32 %v850_v8, %v770_v58  ;;  %v803_v60 = vld [vmem:[%s2911_s8 + $0x48] sm:$0xff] }
 0x14b   : > { %1939 = vlog2.f32 %v973_v0  ;;  %v1926_v15 = vpop.eup %1925  ;;  %v1612_v21 = vadd.f32 -0.5, %v1141_v62  ;;  %v1115_v23 = vmul.f32 %v1924_v5, %v1063_v50  ;;  %v956_v53 = vsub.f32 %v802_v38, %v770_v58  ;;  %v3149_v38 = vld [vmem:[%s2903_s17 + $0x70] sm:$0xff] }
 0x14c   : > { %1941 = vlog2.f32 %v975_v6  ;;  %v1928_v16 = vpop.eup %1927  ;;  %v1001_v22 = vmul.f32 0.6931472, %v1926_v15  ;;  %v1051_v49 = vmul.f32 %v955_v63, %v955_v63  ;;  %v1707_v50 = vpack.c.bf16 %v867_v14, %v866_v28  ;;  %v3130_v15 = vld [vmem:[%s2903_s17 + $0x68] sm:$0xff] }
 0x14d   : > { %v1930_v27 = vpop.eup %1929  ;;  %v1003_v26 = vmul.f32 0.6931472, %v1928_v16  ;;  %1943 = vrcp.f32 %v1098_v7  ;;  %v1172_v42 = vadd.f32 %v1612_v21, %v1611_v20  ;;  %v1085_v61 = vmul.f32 2.0, %v3099_v44 }
 0x14e   : > { %v1932_v29 = vpop.eup %1931  ;;  %v1142_v19 = vadd.f32 %v1113_v10, %v1001_v22  ;;  %v977_v30 = vmul.f32 %v1930_v27, %v3036_v34  ;;  %1945 = vrcp.f32 %v1099_v11  ;;  %v852_v34 = vmul.f32 %v836_v24, %v3088_v32  ;;  %v804_v27 = vld [vmem:[%s2911_s8 + $0x50] sm:$0xff] }
 0x14f   : > { %1705 = vmatpush3.bf16.xpose.msra.mxu0 %v1704_v3  ;;  %v1934_v35 = vpop.eup %1933  ;;  %v979_v36 = vmul.f32 %v1932_v29, %v3039_v39  ;;  %1947 = vrcp.f32 %v3063_v4  ;;  %v1143_v43 = vadd.f32 %v1115_v23, %v1003_v26  ;;  %v869_v0 = vadd.f32 %v853_v37, %v3105_v47  ;;  %v3139_v26 = vld [vmem:[%s2897_s29 + $0x60] sm:$0xff] }
 0x150   : > { %1706 = vmatprep.subr.bf16.mxu0 %v2401_v2  ;;  %v1936_v41 = vpop.eup %1935  ;;  %v1613_v40 = vadd.f32 -0.5, %v1142_v19  ;;  %1949 = vlog2.f32 %v977_v30  ;;  %v1117_v52 = vmul.f32 %v1934_v35, %v3052_v55  ;;  %v868_v62 = vadd.f32 %v852_v34, %v3102_v46  ;;  %v3144_v19 = vld [vmem:[%s2897_s29 + $0x68] sm:$0xff] }
 0x151   : > { %v1938_v39 = vpop.eup %1937  ;;  %1951 = vlog2.f32 %v979_v36  ;;  %v1614_v1 = vadd.f32 -0.5, %v1143_v43  ;;  %v1086_v55 = vmul.f32 2.0, %v3108_v51  ;;  %v1119_v7 = vmul.f32 %v1936_v41, %v3054_v56  ;;  %v839_v56 = vld [vmem:[%s2905_s28 + $0x68] sm:$0xff] }
 0x152   : > { %v981_v54 = vmul.f32 %v1938_v39, %v3057_v59  ;;  %1953 = vrcp.f32 %v1100_v31  ;;  %v1173_v3 = vadd.f32 %v1613_v40, %v1172_v42  ;;  %v3119_v59 = vld [vmem:[%s2903_s17 + $0x60] sm:$0xff]  ;;  %v1066_v8 = vadd.f32 %v1050_v48, %v1034_v17  ;;  %v805_v42 = vld [vmem:[%s2911_s8 + $0x58] sm:$0xff]  ;;  %v840_v48 = vld [vmem:[%s2905_s28 + $0x70] sm:$0xff] }
 0x153   : > { %1955 = vrcp.f32 %v3088_v32  ;;  %v1067_v11 = vadd.f32 %v1051_v49, %v3079_v18  ;;  %v957_v58 = vsub.f32 %v803_v60, %v3072_v12  ;;  %v1052_v16 = vmul.f32 %v956_v53, %v956_v53  ;;  %v3155_v39 = vld [vmem:[%s2903_s17 + $0x78] sm:$0xff] }
 0x154   : > { %1957 = vlog2.f32 %v981_v54  ;;  %v1101_v20 = vmul.f32 %v1085_v61, %v3099_v44  ;;  %v1174_v12 = vadd.f32 %v1614_v1, %v1173_v3  ;;  %v1710_v21 = vpack.c.bf16 %v869_v0, %v868_v62  ;;  %v841_v53 = vld [vmem:[%s2905_s28 + $0x78] sm:$0xff] }
 0x155   : > { %v1940_v57 = vpop.eup %1939  ;;  %1959 = vrcp.f32 %v3091_v33  ;;  %v1102_v45 = vmul.f32 %v1086_v55, %v3108_v51  ;;  %v854_v22 = vmul.f32 %v838_v9, %v3119_v59  ;;  %v855_v28 = vmul.f32 %v839_v56, %v3130_v15 }
 0x156   : > { %v1942_v5 = vpop.eup %1941  ;;  %v1005_v6 = vmul.f32 0.6931472, %v1940_v57  ;;  %1961 = vrcp.f32 %v3119_v59  ;;  %v1037_v35 = vmul.f32 %v3063_v4, %v3063_v4  ;;  %v1068_v36 = vadd.f32 %v1052_v16, %v1036_v13  ;;  %v823_v13 = vld [vmem:[%s2913_s19 + $0x68] sm:$0xff] }
 0x157   : > { %1708 = vmatpush3.bf16.xpose.msra.mxu0 %v1707_v50  ;;  %v1007_v10 = vmul.f32 0.6931472, %v1942_v5  ;;  %v1944_v63 = vpop.eup %1943  ;;  %1963 = vrcp.f32 %v3130_v15  ;;  %v1053_v41 = vmul.f32 %v957_v58, %v957_v58  ;;  %v958_v43 = vsub.f32 %v804_v27, %v3102_v46  ;;  %v821_v5 = vld [vmem:[%s2913_s19 + $0x58] sm:$0xff] }
 0x158   : > { %1709 = vmatprep.subr.bf16.mxu0 %v2401_v2  ;;  %v1144_v17 = vadd.f32 %v1117_v52, %v1005_v6  ;;  %v1946_v18 = vpop.eup %1945  ;;  %v1121_v29 = vmul.f32 %v1944_v63, %v1066_v8  ;;  %1965 = vrcp.f32 %v1101_v20  ;;  %v870_v40 = vadd.f32 %v854_v22, %v3139_v26 }
 0x159   : > { %v1948_v23 = vpop.eup %1947  ;;  %v1145_v24 = vadd.f32 %v1119_v7, %v1007_v10  ;;  %v1123_v37 = vmul.f32 %v1946_v18, %v1067_v11  ;;  %1967 = vrcp.f32 %v1102_v45  ;;  %v871_v4 = vadd.f32 %v855_v28, %v3144_v19  ;;  %v776_v18 = vld [vmem:[%s2897_s29 + $0x70] sm:$0xff]  ;;  %v806_v28 = vld [vmem:[%s2911_s8 + $0x60] sm:$0xff] }
 0x15a   : > { %v1615_v25 = vadd.f32 -0.5, %v1144_v17  ;;  %v1950_v14 = vpop.eup %1949  ;;  %1969 = vrcp.f32 %v3149_v38  ;;  %v983_v46 = vmul.f32 %v1948_v23, %v3099_v44  ;;  %v959_v57 = vsub.f32 %v805_v42, %v3105_v47  ;;  %v822_v47 = vld [vmem:[%s2913_s19 + $0x60] sm:$0xff] }
 0x15b   : > { %v1952_v30 = vpop.eup %1951  ;;  %v1009_v31 = vmul.f32 0.6931472, %v1950_v14  ;;  %v1616_v50 = vadd.f32 -0.5, %v1145_v24  ;;  %v856_v1 = vmul.f32 %v840_v48, %v3149_v38  ;;  %1971 = vrcp.f32 %v3155_v39  ;;  %v825_v24 = vld [vmem:[%s2913_s19 + $0x78] sm:$0xff] }
 0x15c   : > { %v1954_v34 = vpop.eup %1953  ;;  %v1175_v52 = vadd.f32 %v1615_v25, %v1174_v12  ;;  %v1011_v60 = vmul.f32 0.6931472, %v1952_v30  ;;  %v857_v55 = vmul.f32 %v841_v53, %v3155_v39  ;;  %1973 = vlog2.f32 %v983_v46  ;;  %v777_v12 = vld [vmem:[%s2897_s29 + $0x78] sm:$0xff] }
 0x15d   : > { %v1956_v49 = vpop.eup %1955  ;;  %v1146_v61 = vadd.f32 %v1121_v29, %v1009_v31  ;;  %v1125_v0 = vmul.f32 %v1954_v34, %v1068_v36  ;;  %v1069_v44 = vadd.f32 %v1053_v41, %v1037_v35  ;;  %v1713_v9 = vpack.c.bf16 %v871_v4, %v870_v40 }
 0x15e   : > { %v1958_v54 = vpop.eup %1957  ;;  %v985_v6 = vmul.f32 %v1956_v49, %v3108_v51  ;;  %v1176_v8 = vadd.f32 %v1616_v50, %v1175_v52  ;;  %v1147_v11 = vadd.f32 %v1123_v37, %v1011_v60  ;;  %v1038_v51 = vmul.f32 %v3088_v32, %v3088_v32  ;;  %v807_v52 = vld [vmem:[%s2911_s8 + $0x68] sm:$0xff] }
 0x15f   : > { %1711 = vmatpush3.bf16.xpose.msra.mxu0 %v1710_v21  ;;  %v1960_v62 = vpop.eup %1959  ;;  %v1013_v3 = vmul.f32 0.6931472, %v1958_v54  ;;  %v1617_v58 = vadd.f32 -0.5, %v1146_v61  ;;  %v3175_v17 = vmul.f32 %v3091_v33, %v3091_v33  ;;  %v1054_v16 = vmul.f32 %v958_v43, %v958_v43  ;;  %v824_v21 = vld [vmem:[%s2913_s19 + $0x70] sm:$0xff] }
 0x160   : > { %1712 = vmatprep.subr.bf16.mxu0 %v2401_v2  ;;  %v1962_v7 = vpop.eup %1961  ;;  %v987_v10 = vmul.f32 %v1960_v62, %v821_v5  ;;  %1975 = vlog2.f32 %v985_v6  ;;  %v3177_v20 = vmul.f32 %v959_v57, %v959_v57  ;;  %v872_v22 = vadd.f32 %v856_v1, %v776_v18  ;;  %v808_v54 = vld [vmem:[%s2911_s8 + $0x70] sm:$0xff] }
 0x161   : > { %v989_v56 = vmul.f32 %v1962_v7, %v822_v47  ;;  %v1964_v63 = vpop.eup %1963  ;;  %v1148_v45 = vadd.f32 %v1125_v0, %v1013_v3  ;;  %v873_v23 = vadd.f32 %v857_v55, %v777_v12  ;;  %v1087_v32 = vmul.f32 2.0, %v821_v5  ;;  %v809_v0 = vld [vmem:[%s2911_s8 + $0x78] sm:$0xff] }
 0x162   : > { %v991_v25 = vmul.f32 %v1964_v63, %v823_v13  ;;  %v1966_v27 = vpop.eup %1965  ;;  %1977 = vlog2.f32 %v987_v10  ;;  %v1088_v14 = vmul.f32 2.0, %v822_v47  ;;  %v1089_v29 = vmul.f32 2.0, %v823_v13 }
 0x163   : > { %v1618_v33 = vadd.f32 -0.5, %v1147_v11  ;;  %v1177_v30 = vadd.f32 %v1617_v58, %v1176_v8  ;;  %1979 = vlog2.f32 %v989_v56  ;;  %v1090_v31 = vmul.f32 2.0, %v824_v21  ;;  %v1968_v35 = vpop.eup %1967 }
 0x164   : > { %v1070_v36 = vadd.f32 %v1054_v16, %v1038_v51  ;;  %v1091_v34 = vmul.f32 2.0, %v825_v24  ;;  %v1103_v37 = vmul.f32 %v1087_v32, %v821_v5  ;;  %v1104_v41 = vmul.f32 %v1088_v14, %v822_v47  ;;  %v1970_v42 = vpop.eup %1969  ;;  %v875_v51 = vld [vmem:[%s3486_s22] sm:$0xff] }
 0x165   : > { %v1127_v43 = vmul.f32 %v1966_v27, %v1069_v44  ;;  %v960_v40 = vsub.f32 %v806_v28, %v3139_v26  ;;  %v1716_v48 = vpack.c.bf16 %v873_v23, %v872_v22  ;;  %1981 = vlog2.f32 %v991_v25  ;;  %v1972_v49 = vpop.eup %1971 }
 0x166   : > { %v1619_v50 = vadd.f32 -0.5, %v1148_v45  ;;  %v993_v4 = vmul.f32 %v1970_v42, %v824_v21  ;;  %1983 = vrcp.f32 %v1103_v37  ;;  %v1974_v53 = vpop.eup %1973  ;;  %v995_v60 = vmul.f32 %v1972_v49, %v825_v24 }
 0x167   : > { %1714 = vmatpush3.bf16.xpose.msra.mxu0 %v1713_v9  ;;  %v1106_v61 = vmul.f32 %v1090_v31, %v824_v21  ;;  %1985 = vrcp.f32 %v1104_v41  ;;  %v1178_v46 = vadd.f32 %v1618_v33, %v1177_v30  ;;  %v1129_v62 = vmul.f32 %v1968_v35, %v1070_v36 }
 0x168   : > { %1715 = vmatprep.subr.bf16.mxu0 %v2401_v2  ;;  %v1105_v2 = vmul.f32 %v1089_v29, %v823_v13  ;;  %v1015_v57 = vmul.f32 0.6931472, %v1974_v53  ;;  %1987 = vlog2.f32 %v993_v4  ;;  %v1107_v26 = vmul.f32 %v1091_v34, %v825_v24 }
 0x169   : > { %v961_v3 = vsub.f32 %v807_v52, %v3144_v19  ;;  %v1040_v55 = vmul.f32 %v3119_v59, %v3119_v59  ;;  %v1056_v5 = vmul.f32 %v960_v40, %v960_v40  ;;  %1989 = vlog2.f32 %v995_v60 }
 0x16a   : > { %v1976_v1 = vpop.eup %1975  ;;  %v962_v6 = vsub.f32 %v808_v54, %v776_v18  ;;  %1991 = vrcp.f32 %v1105_v2  ;;  %v1149_v8 = vadd.f32 %v1127_v43, %v1015_v57  ;;  %v963_v44 = vsub.f32 %v809_v0, %v777_v12 }
 0x16b   : > { %v1017_v7 = vmul.f32 0.6931472, %v1976_v1  ;;  %1993 = vrcp.f32 %v1106_v61  ;;  %v1179_v9 = vadd.f32 %v1619_v50, %v1178_v46  ;;  %v1071_v19 = vadd.f32 %v3177_v20, %v3175_v17 }
 0x16c   : > { %v1978_v47 = vpop.eup %1977  ;;  %1995 = vrcp.f32 %v1107_v26  ;;  %v1620_v11 = vadd.f32 -0.5, %v1149_v8  ;;  %v1057_v59 = vmul.f32 %v961_v3, %v961_v3  ;;  %v1041_v13 = vmul.f32 %v3130_v15, %v3130_v15 }
 0x16d   : > { %v1150_v10 = vadd.f32 %v1129_v62, %v1017_v7  ;;  %v1980_v58 = vpop.eup %1979  ;;  %v1072_v56 = vadd.f32 %v1056_v5, %v1040_v55  ;;  %v1058_v63 = vmul.f32 %v962_v6, %v962_v6  ;;  %v1042_v16 = vmul.f32 %v3149_v38, %v3149_v38  ;;  %v874_v6 = vld [vmem:[%s2947_s16] sm:$0xff] }
 0x16e   : > { %v1043_v18 = vmul.f32 %v3155_v39, %v3155_v39  ;;  %v1019_v21 = vmul.f32 0.6931472, %v1978_v47  ;;  %v1059_v45 = vmul.f32 %v963_v44, %v963_v44  ;;  %v1180_v23 = vadd.f32 %v1620_v11, %v1179_v9  ;;  %v1196_v9 = vld [vmem:[%s2949_s21] sm:$0xff] }
 0x16f   : > { %1717 = vmatpush3.bf16.xpose.msra.mxu0 %v1716_v48  ;;  %v1982_v12 = vpop.eup %1981  ;;  %v1621_v22 = vadd.f32 -0.5, %v1150_v10  ;;  %v1021_v20 = vmul.f32 0.6931472, %v1980_v58  ;;  %v1073_v15 = vadd.f32 %v1057_v59, %v1041_v13  ;;  %v1074_v28 = vadd.f32 %v1058_v63, %v1042_v16  ;;  %v1205_v11 = vld [vmem:[%s746_s5] sm:$0x1] (!%p1627_p4) }
 0x170   : > { %v1984_v17 = vpop.eup %1983  ;;  %v1023_v29 = vmul.f32 0.6931472, %v1982_v12  ;;  %v1075_v38 = vadd.f32 %v1059_v45, %v1043_v18  ;;  %v1213_v58 = vlaneseq (!%p1627_p4)  ;;  %v1208_v59 = vld [vmem:[%s749_s10] sm:$0x1] (!%p1627_p4)  ;;  %1997 = vrcp.f32 (!%p1627_p4), %v1205_v11 }
 0x171   : > { %v1986_v24 = vpop.eup %1985  ;;  %v1131_v25 = vmul.f32 %v1984_v17, %v1071_v19  ;;  %v1181_v30 = vadd.f32 %v1621_v22, %v1180_v23  ;;  %v1207_v19 = vld [vmem:[%s755_s24] sm:$0x1] (!%p1627_p4)  ;;  %v1209_v13 = vmul.f32 (!%p1627_p4), %v1208_v59, %v1205_v11 }
 0x172   : > { %v1988_v27 = vpop.eup %1987  ;;  %v1133_v32 = vmul.f32 %v1986_v24, %v1072_v56  ;;  %v1214_v56 = vshrl.u32 (!%p1627_p4), %v1213_v58, 7  ;;  %v1228_v63 = vmul.f32 (!%p1627_p4), 2.0, %v1207_v19  ;;  %v1206_v22 = vld [vmem:[%s752_s25] sm:$0x1] (!%p1627_p4) }
 0x173   : > { %v1990_v14 = vpop.eup %1989  ;;  %v1151_v33 = vadd.f32 %v1131_v25, %v1019_v21  ;;  %v1025_v31 = vmul.f32 0.6931472, %v1988_v27 }
 0x174   : > { %v1992_v39 = vpop.eup %1991  ;;  %v1152_v35 = vadd.f32 %v1133_v32, %v1021_v20  ;;  %v1027_v34 = vmul.f32 0.6931472, %v1990_v14  ;;  %v1215_v18 = vsub.s32 (!%p1627_p4), 0, %v1214_v56  ;;  %v1229_v45 = vmul.f32 (!%p1627_p4), %v1228_v63, %v1207_v19 }
 0x175   : > { %v1994_v36 = vpop.eup %1993  ;;  %v1135_v37 = vmul.f32 %v1992_v39, %v1073_v15  ;;  %v1622_v41 = vadd.f32 -0.5, %v1151_v33  ;;  %v1225_v15 = vmul.f32 (!%p1627_p4), %v1205_v11, %v1205_v11 }
 0x176   : > { %1692 = vmatmul.mubr.f32.vlgmr.msra.gmra.mrb[0].mxu0 %v875_v51  ;;  %v1996_v42 = vpop.eup %1995  ;;  %v1137_v43 = vmul.f32 %v1994_v36, %v1074_v28  ;;  %v1623_v40 = vadd.f32 -0.5, %v1152_v35  ;;  %v1204_v51 = vld [vmem:[%s743_s27] sm:$0x1] (!%p1627_p4)  ;;  %1999 = vrcp.f32 (!%p1627_p4), %v1229_v45 }
 0x177   : > { %v1139_v48 = vmul.f32 %v1996_v42, %v1075_v38  ;;  %v1153_v49 = vadd.f32 %v1135_v37, %v1023_v29  ;;  %v1182_v50 = vadd.f32 %v1622_v41, %v1181_v30  ;;  %v1210_v16 = vadd.f32 (!%p1627_p4), %v1209_v13, %v1204_v51 }
 0x178   : > { %v1154_v52 = vadd.f32 %v1137_v43, %v1025_v31  ;;  %v1220_v20 = vsub.f32 (!%p1627_p4), %v1206_v22, %v1204_v51 }
 0x179   : > { %v1155_v4 = vadd.f32 %v1139_v48, %v1027_v34  ;;  %v1624_v2 = vadd.f32 -0.5, %v1153_v49  ;;  %v1183_v53 = vadd.f32 %v1623_v40, %v1182_v50  ;;  %v1216_v21 = vrot.slane (!%p1627_p4), %v1210_v16, %v1215_v18 }
 0x17a   : > { %v1625_v54 = vadd.f32 -0.5, %v1154_v52  ;;  %v1998_v17 = vpop.eup (!%p1627_p4), %1997  ;;  %v1226_v25 = vmul.f32 (!%p1627_p4), %v1220_v20, %v1220_v20 }
 0x17b   : > { %v1626_v60 = vadd.f32 -0.5, %v1155_v4  ;;  %v1184_v61 = vadd.f32 %v1624_v2, %v1183_v53  ;;  %v1222_v24 = vmul.f32 (!%p1627_p4), %v1998_v17, %v1207_v19 }
 0x17c   : > { %v1227_v27 = vadd.f32 (!%p1627_p4), %v1226_v25, %v1225_v15 }
 0x17d   : > { %v1185_v46 = vadd.f32 %v1625_v54, %v1184_v61  ;;  %2001 = vlog2.f32 (!%p1627_p4), %v1222_v24 }
 0x17f   : > { %v1186_v62 = vadd.f32 %v1626_v60, %v1185_v46 }
 0x180   : > { %v2000_v28 = vpop.eup (!%p1627_p4), %1999 }
 0x181   : > { %1187 = vadd.xlane.f32.xlu0 %v1186_v62  ;;  %v1231_v32 = vmul.f32 (!%p1627_p4), %v2000_v28, %v1227_v27 }
 0x187   : > { %v2002_v14 = vpop.eup (!%p1627_p4), %2001 }
 0x188   : > { %v1224_v29 = vmul.f32 (!%p1627_p4), 0.6931472, %v2002_v14 }
 0x18a   : > { %v1232_v38 = vadd.f32 (!%p1627_p4), %v1231_v32, %v1224_v29 }
 0x18c   : > { %v1628_v33 = vadd.f32 (!%p1627_p4), -0.5, %v1232_v38 }
 0x18e   : > { %v1235_v30 = vsel (!%p1627_p4), %vm1234_vm1, %v1628_v33, 0.0 }
 0x18f   : > { %1236 = vadd.xlane.f32.xlu0 (!%p1627_p4), %v1235_v30 }
 0x20e   : > { %v1188_v0 = vpop.xlane.xlu0 %1187 }
 0x20f   : > { %v1189_v57 = vrot.slane %v1188_v0, 4 }
 0x211   : > { %v1190_v26 = vadd.f32 %v1189_v57, %v1188_v0 }
 0x213   : > { %v1191_v1 = vrot.slane %v1190_v26, 2 }
 0x215   : > { %v1192_v3 = vadd.f32 %v1191_v1, %v1190_v26 }
 0x217   : > { %v1193_v55 = vrot.slane %v1192_v3, 1 }
 0x219   : > { %v1194_v5 = vadd.f32 %v1193_v55, %v1192_v3 }
 0x21b   : > { %1718 = vpush %v1194_v5 }
 0x21c   : > { %v1237_v39 = vpop.xlane.xlu0 (!%p1627_p4), %1236 }
 0x21d   : > { %v1238_v31 = vrot.slane (!%p1627_p4), %v1237_v39, 4 }
 0x21f   : > { %v1239_v35 = vadd.f32 (!%p1627_p4), %v1238_v31, %v1237_v39 }
 0x221   : > { %v1240_v36 = vrot.slane (!%p1627_p4), %v1239_v35, 2 }
 0x223   : > { %v1241_v34 = vadd.f32 (!%p1627_p4), %v1240_v36, %v1239_v35 }
 0x225   : > { %v1242_v37 = vrot.slane (!%p1627_p4), %v1241_v34, 1 }
 0x227   : > { %v1243_v41 = vadd.f32 (!%p1627_p4), %v1242_v37, %v1241_v34 }
 0x229   : > { %1720 = vpush (!%p1627_p4), %v1243_v41 }
 0x249   : > { %v942_v7 = vpop.f32.mrb[0].mxu0 }
 0x24a   : > { %v946_v8 = vadd.f32 %v942_v7, %v874_v6  ;;  %v1693_v44 = vpop.f32.mrb[1].mxu0  ;;  %1203 = sbr.rel (%p1627_p4) target bundleno = 607 (0x25f), region = 96 }
 0x24c   : > { %947 = vst [vmem:[%s2947_s16] sm:$0xff] %v946_v8  ;;  %s1719_s23 = spop %1718 }
 0x24d   : > { %v1197_v47 = vstv %s1719_s23 }
 0x24e   : > { %v1198_v10 = vadd.f32 %v1197_v47, %v1196_v9 }
 0x250   : > { %1199 = vst [vmem:[%s2949_s21] sm:$0xff] %v1198_v10 }
 0x253   : > { %v1211_v12 = vld [vmem:[%s2947_s16] sm:$0xff] }
 0x254   : > { %v1218_v23 = vadd.f32 %v1216_v21, %v1211_v12 }
 0x256   : > { %1219 = vst [vmem:[%s2947_s16] sm:$0xff] %v1218_v23 }
 0x257   : > { %v1245_v42 = vld [vmem:[%s2949_s21] sm:$0xff] }
 0x25a   : > { %s1721_s25 = spop %1720 }
 0x25b   : > { %v1246_v43 = vstv %s1721_s25 }
 0x25c   : > { %v1247_v40 = vadd.f32 %v1246_v43, %v1245_v42 }
 0x25e   : > { %1248 = vst [vmem:[%s2949_s21] sm:$0xff] %v1247_v40 }
 0x25f PF: > { %s3493_s10 = sld [smem:[#allocation31_spill]]  ;;  %s3494_s14 = sld [smem:[#allocation30_spill]] }
 0x260   : > { %s1270_s3 = sshll.u32 %s2947_s16, 4  ;;  %s3495_s23 = sld [smem:[#allocation57_spill]]  ;;  %s3242_s3 = int_to_ptr.vmem [resolvable:$true] %s1270_s3 }
 0x261   : > { %s1250_s9 = scalar_lea.sflag [#allocation4], %s2920_s2  ;;  %s2183_s13 = scalar_lea.vmem %s3242_s3, 128 }
 0x262   : > { %p2184_p2 = scmp.ne.s32.totalorder %s3242_s3, %s2183_s13  ;;  %p3497_p8 = scmp.ne.s32.totalorder %s3457_s4, 0 }
 0x263   : > { %s2404_s29 = smov [#allocation13]  }
 0x264   : > { %p2185_p13 = pnand %p2184_p2, %p3497_p8  ;;  %s2187_s17 = sshll.u32 %s2404_s29, 4  ;;  %s2188_s17 = int_to_ptr.vmem [resolvable:$false] %s2187_s17 }
 0x265   : > { %s1631_s27 = sshll.u32 %s3493_s10, 1  ;;  %s2189_s16 = scalar_lea.vmem %s2188_s17, 256 }
 0x266   : > { %s3238_s12 = sadd.s32 %s3494_s14, %s1631_s27  ;;  %s3496_s6 = smov %s3495_s23 }
 0x267   : > { %s1632_s24 = sshll.u32 %s3238_s12, 7  ;;  %p2186_p11 = pneg %p2185_p13 }
 0x268   : > { %s1268_s26 = scalar_lea.hbm %s3495_s23, %s1632_s24  ;;  %p2190_p1 = scmp.lt.s32.totalorder %s3242_s3, %s2188_s17 }
 0x269   : > { %p2191_p3 = scmp.lt.s32.totalorder %s2189_s16, %s2183_s13 }
 0x26b   : > { %p2192_p9 = por %p2191_p3, %p2190_p1 }
 0x26d   : > { %p2193_p0 = pnand %p2192_p9, %p2186_p11 }
 0x26f   : > { %2196 = shalt.err (!%p2193_p0)
}
 0x270   : > { %s2197_s28 = scalar_lea.hbm %s1268_s26, 128  ;;  %s2201_s7 = scalar_lea.hbm %s3496_s6, 512 }
 0x271   : > { %p2198_p7 = scmp.ne.s32.totalorder %s1268_s26, %s2197_s28  ;;  %p2202_p5 = scmp.lt.u32.totalorder %s1268_s26, %s3496_s6 }
 0x272   : > { %p2203_p12 = scmp.lt.u32.totalorder %s2201_s7, %s2197_s28  ;;  %p2205_p2 = scmp.lt.u32.totalorder %s2197_s28, %s1268_s26 }
 0x273   : > { %p2199_p10 = pnand %p2198_p7, %p3497_p8 }
 0x274   : > { %p2204_p4 = por %p2203_p12, %p2202_p5 }
 0x275   : > { %p2200_p6 = pneg %p2199_p10 }
 0x276   : > { %p2206_p13 = por %p2205_p2, %p2204_p4 }
 0x278   : > { %p2207_p11 = pnand %p2206_p13, %p2200_p6 }
 0x27a   : > { %2210 = shalt.err (!%p2207_p11)
}
 0x27b   : > { %1734 = dma.vmem_to_hbm [thread:$0]  (%p3497_p8), %s3242_s3, 128, %s1268_s26, %s1250_s9  }
 0x27c   : > { %s3498_s11 = sld [smem:[#allocation58_spill]]  ;;  %s1285_s25 = sshll.u32 %s2949_s21, 4  ;;  %s1286_s25 = int_to_ptr.vmem [resolvable:$true] %s1285_s25 }
 0x27d   : > { %s1255_s10 = scalar_lea.sflag [#allocation15], %s2920_s2  ;;  %s2211_s14 = scalar_lea.vmem %s1286_s25, 128 }
 0x27e   : > { %p2212_p1 = scmp.ne.s32.totalorder %s1286_s25, %s2211_s14  ;;  %s2405_s27 = smov [#allocation14]  }
 0x27f   : > { %s2215_s1 = sshll.u32 %s2405_s27, 4  ;;  %s2216_s1 = int_to_ptr.vmem [resolvable:$false] %s2215_s1 }
 0x280   : > { %p2213_p3 = pnand %p2212_p1, %p3497_p8  ;;  %s2217_s22 = scalar_lea.vmem %s2216_s1, 256 }
 0x281   : > { %p2218_p0 = scmp.lt.s32.totalorder %s1286_s25, %s2216_s1  ;;  %p2219_p7 = scmp.lt.s32.totalorder %s2217_s22, %s2211_s14 }
 0x282   : > { %s3271_s15 = scalar_lea.hbm %s3498_s11, %s1632_s24  ;;  %p2214_p9 = pneg %p2213_p3 }
 0x283   : > { %p2220_p10 = por %p2219_p7, %p2218_p0 }
 0x285   : > { %p2221_p6 = pnand %p2220_p10, %p2214_p9 }
 0x287   : > { %2224 = shalt.err (!%p2221_p6)
}
 0x288   : > { %s2225_s21 = scalar_lea.hbm %s3271_s15, 128  ;;  %s2229_s3 = scalar_lea.hbm %s3498_s11, 512 }
 0x289   : > { %p2226_p5 = scmp.ne.s32.totalorder %s3271_s15, %s2225_s21  ;;  %p2230_p2 = scmp.lt.u32.totalorder %s3271_s15, %s3498_s11 }
 0x28a   : > { %p2231_p13 = scmp.lt.u32.totalorder %s2229_s3, %s2225_s21  ;;  %p2233_p1 = scmp.lt.u32.totalorder %s2225_s21, %s3271_s15 }
 0x28b   : > { %p2227_p12 = pnand %p2226_p5, %p3497_p8 }
 0x28c   : > { %p2232_p11 = por %p2231_p13, %p2230_p2 }
 0x28d   : > { %p2228_p4 = pneg %p2227_p12 }
 0x28e   : > { %p2234_p3 = por %p2233_p1, %p2232_p11 }
 0x290   : > { %p2235_p9 = pnand %p2234_p3, %p2228_p4 }
 0x292   : > { %2238 = shalt.err (!%p2235_p9)
}
 0x293   : > { %1735 = dma.vmem_to_hbm [thread:$0]  (%p3497_p8), %s1286_s25, 128, %s3271_s15, %s1255_s10  }
 0x294 PF: > { %s3499_s26 = sld [smem:[#allocation22_spill]]  ;;  %p1765_p0 = scmp.ge.s32.totalorder %s2389_s18, 2 }
 0x295   : > { %s3500_s9 = sld [smem:[#allocation45_spill]] }
 0x29a   : > { %s1297_s13 = sand.u32 1, %s3499_s26  }
 0x29b   : > { %p3501_p7 = scmp.ne.s32.totalorder %s3500_s9, 0  ;;  %s1298_s29 = scalar_lea.sflag [#allocation4], %s1297_s13 }
 0x29d   : > { %p1758_p10 = pnand %p1765_p0, %p3501_p7 }
 0x29f   : > { %2320 = dma.done.wait (!%p1758_p10), %s1298_s29, 128  }
 0x2a0   : > { %2322 = vsyncadd (!%p1758_p10), %s1298_s29, 4294967168  ;;  %s1307_s17 = scalar_lea.sflag [#allocation15], %s1297_s13 }
 0x2a1   : > { %2324 = dma.done.wait (!%p1758_p10), %s1307_s17, 128  }
 0x2a2   : > { %2326 = vsyncadd (!%p1758_p10), %s1307_s17, 4294967168  ;;  %s41_s18 = sadd.s32 1, %s2389_s18   ;;  %s3503_s21 = sld [smem:[#allocation23_spill]] }
 0x2a3   : > { %p3297_p6 = scmp.ge.s32.totalorder %s41_s18, 10   ;;  %s3504_s22 = sld [smem:[#allocation24_spill]] }
 0x2a4   : > { %s3505_s23 = sld [smem:[#allocation44_spill]]  ;;  %s3506_s24 = sld [smem:[#allocation25_spill]] }
 0x2a5   : > { %s3507_s25 = sld [smem:[#allocation26_spill]]  ;;  %s3508_s26 = sld [smem:[#allocation42_spill]] }
 0x2a6   : > { %s3509_s27 = sld [smem:[#allocation27_spill]]  ;;  %s3510_s28 = sld [smem:[#allocation28_spill]] }
 0x2a7   : > { %s3511_s29 = sld [smem:[#allocation43_spill]]  ;;  %s3512_s30 = sld [smem:[#allocation32_spill]] }
 0x2a8   : > { %s3513_s13 = sld [smem:[#allocation33_spill]]  ;;  %s3514_s14 = sld [smem:[#allocation34_spill]] }
 0x2a9   : > { %s3515_s15 = sld [smem:[#allocation38_spill]]  ;;  %s3516_s16 = sld [smem:[#allocation39_spill]] }
 0x2aa   : > { %s3517_s17 = sld [smem:[#allocation41_spill]]  ;;  %40 = sbr.rel (!%p3297_p6) target bundleno = 33 (0x21), region = 210 }
 0x2b1   :  { %1312 = vsyncpa [#allocation3], 1 }
 0x2b2   :  { %1314 = vsyncpa [#allocation3 + $0x1], 1 }
 0x2b3   :  { %1315 = vsyncpa [#allocation6], 1 }
 0x2b4   :  { %1317 = vsyncpa [#allocation6 + $0x1], 1 }
 0x2b5   :  { %1318 = vsyncpa [#allocation9], 1 }
 0x2b6   :  { %1320 = vsyncpa [#allocation9 + $0x1], 1 }
 0x2b7   :  { %1321 = vsyncpa [#allocation12], 1 }
 0x2b8   :  { %1323 = vsyncpa [#allocation12 + $0x1], 1 }
 0x2b9   :  { %1324 = vsyncpa [#allocation4], 1 }
 0x2ba   :  { %1326 = vsyncpa [#allocation4 + $0x1], 1 }
 0x2bb   :  { %1327 = vsyncpa [#allocation15], 1 }
 0x2bc   :  { %1329 = vsyncpa [#allocation15 + $0x1], 1 }

</bundles_post_ra>
